<compile_context>
chip_gen: v5e
topology: v5e:2x2
jax: 0.10.0
libtpu: 0.0.40
codegen_flags: <defaults>
</compile_context>

<pallas_src>
import jax
import jax.numpy as jnp
from jax.experimental import pallas as pl
from jax.experimental.pallas import tpu as pltpu


def _sent_regressor_kernel(
    x_ref,        # (S*B, 2*input_dim), row index = t*B + b
    w_ih0_ref,    # (IN2, 4H)   pre-transposed
    w_hh0_ref,    # (H, 4H)     pre-transposed
    b0_ref,       # (1, 4H)     b_ih0 + b_hh0
    w_l1_ref,     # (2H, 4H)    fused [w_ih1^T ; w_hh1^T]
    b1_ref,       # (1, 4H)     b_ih1 + b_hh1
    w_fc0_ref,    # (H, OUT)    fc half contracting h0
    w_fc1_ref,    # (H, OUT)    fc half contracting h1
    b_fc_ref,     # (1, OUT)
    w_fc2_ref,    # (1, OUT)
    b_fc2_ref,    # (1, 1)
    out_ref,      # (B, 1)
):
    B = out_ref.shape[0]
    H = w_hh0_ref.shape[0]
    S = x_ref.shape[0] // B

    # Hoisted layer-0 input projection for ALL timesteps: one MXU matmul with
    # M = S*B instead of S matmuls with M = B, and it sits off the serial
    # recurrence critical path.
    xg0 = jnp.dot(x_ref[...], w_ih0_ref[...],
                  preferred_element_type=jnp.float32) + b0_ref[...]

    w_hh0 = w_hh0_ref[...]
    w_l1 = w_l1_ref[...]
    b1 = b1_ref[...]

    def activate(gates):
        # Two full-width EUP passes over the (B, 4H) tile; i/f/g/o are free
        # static lane sub-views of the activated tiles.
        sig = jax.nn.sigmoid(gates)
        th = jnp.tanh(gates)
        return (sig[:, 0 * H:1 * H], sig[:, 1 * H:2 * H],
                th[:, 2 * H:3 * H], sig[:, 3 * H:4 * H])

    h0 = jnp.zeros((B, H), jnp.float32)
    c0 = jnp.zeros((B, H), jnp.float32)
    h1 = jnp.zeros((B, H), jnp.float32)
    c1 = jnp.zeros((B, H), jnp.float32)

    # Time recurrence fully in-kernel; state carried in vregs (no VMEM
    # round-trips, no per-step grid overhead). S is small & static -> unroll.
    for t in range(S):
        # Layer 0: input projection precomputed, only h @ W_hh remains.
        g0 = xg0[t * B:(t + 1) * B, :] + jnp.dot(
            h0, w_hh0, preferred_element_type=jnp.float32)
        i0, f0, gg0, o0 = activate(g0)
        c0 = f0 * c0 + i0 * gg0
        h0 = o0 * jnp.tanh(c0)

        # Layer 1: fused [x ; h] @ [W_ih1^T ; W_hh1^T] — one MXU push per step.
        # TODO(synk): inter-layer LSTM dropout + self.dropout are train-time
        # only; inference forward treats them as identity.
        x1 = jnp.concatenate([h0, h1], axis=-1)                  # (B, 2H)
        g1 = jnp.dot(x1, w_l1, preferred_element_type=jnp.float32) + b1
        i1, f1, gg1, o1 = activate(g1)
        c1 = f1 * c1 + i1 * gg1
        h1 = o1 * jnp.tanh(c1)

    # Head: hidden[-2]/hidden[-1] are the final h of layer 0 / layer 1.  The fc
    # weight is split per hidden half in the wrapper, so no in-kernel concat.
    fc_out = (jnp.dot(h0, w_fc0_ref[...], preferred_element_type=jnp.float32)
              + jnp.dot(h1, w_fc1_ref[...], preferred_element_type=jnp.float32)
              + b_fc_ref[...])
    fc_out = jnp.maximum(fc_out, 0.0)
    # fc2 is an N=1 projection: VPU multiply + lane reduce, not an MXU matmul.
    final = jnp.sum(fc_out * w_fc2_ref[...], axis=-1, keepdims=True) + b_fc2_ref[...]
    out_ref[...] = final.astype(out_ref.dtype)


@jax.jit
def sent_regressor_pallas(encoded, w_ih0, w_hh0, b_ih0, b_hh0,
                          w_ih1, w_hh1, b_ih1, b_hh1,
                          w_fc, b_fc, w_fc2, b_fc2):
    """encoded: [S, B, 2*input_dim] (PyTorch seq-major layout)."""
    S, B, IN2 = encoded.shape
    H = w_hh0.shape[1]
    OUT = w_fc.shape[0]

    # Wrapper-side layout plumbing (done once, outside the kernel):
    x2d = encoded.reshape(S * B, IN2)                      # row = t*B + b
    w_ih0_t = w_ih0.T                                      # (IN2, 4H)
    w_hh0_t = w_hh0.T                                      # (H, 4H)
    b0 = (b_ih0 + b_hh0).reshape(1, 4 * H)
    w_l1_t = jnp.concatenate([w_ih1.T, w_hh1.T], axis=0)   # (2H, 4H)
    b1 = (b_ih1 + b_hh1).reshape(1, 4 * H)
    w_fc0_t = w_fc[:, :H].T                                # (H, OUT), pairs with h0
    w_fc1_t = w_fc[:, H:].T                                # (H, OUT), pairs with h1
    b_fc2d = b_fc.reshape(1, OUT)
    w_fc2_2d = w_fc2.reshape(1, OUT)
    b_fc2_2d = b_fc2.reshape(1, 1)

    vmem = pl.BlockSpec(memory_space=pltpu.MemorySpace.VMEM)

    out = pl.pallas_call(
        _sent_regressor_kernel,
        out_shape=jax.ShapeDtypeStruct((B, 1), jnp.float32),
        in_specs=[vmem] * 11,
        out_specs=vmem,
    )(x2d, w_ih0_t, w_hh0_t, b0, w_l1_t, b1,
      w_fc0_t, w_fc1_t, b_fc2d, w_fc2_2d, b_fc2_2d)

    # PyTorch: final_out.squeeze(0) — only removes dim 0 when batch == 1.
    return out[0] if B == 1 else out


def sent_regressor_reference(encoded, w_ih0, w_hh0, b_ih0, b_hh0,
                             w_ih1, w_hh1, b_ih1, b_hh1,
                             w_fc, b_fc, w_fc2, b_fc2):
    H = w_hh0.shape[1]
    B = encoded.shape[1]

    def lstm_layer(x_seq, w_ih, w_hh, b_i, b_h):
        def step(carry, x_t):
            h, c = carry
            gates = x_t @ w_ih.T + h @ w_hh.T + b_i + b_h
            i, f, g, o = jnp.split(gates, 4, axis=-1)
            i = jax.nn.sigmoid(i)
            f = jax.nn.sigmoid(f)
            g = jnp.tanh(g)
            o = jax.nn.sigmoid(o)
            c = f * c + i * g
            h = o * jnp.tanh(c)
            return (h, c), h

        init = (jnp.zeros((B, H), jnp.float32), jnp.zeros((B, H), jnp.float32))
        (h_fin, _), h_seq = jax.lax.scan(step, init, x_seq)
        return h_seq, h_fin

    h_seq0, h_fin0 = lstm_layer(encoded, w_ih0, w_hh0, b_ih0, b_hh0)
    _, h_fin1 = lstm_layer(h_seq0, w_ih1, w_hh1, b_ih1, b_hh1)
    hid = jnp.concatenate([h_fin0, h_fin1], axis=1)              # (B, 2H)
    fc_out = jax.nn.relu(hid @ w_fc.T + b_fc)
    final = fc_out @ w_fc2.T + b_fc2                             # (B, 1)
    return final[0] if B == 1 else final


if __name__ == "__main__":
    input_dim = 16
    hidden_dim = 32
    output_dim = 16
    n_layers = 2          # forward indexes hidden[-2], hidden[-1] -> 2 layers
    seq_len = 8
    batch = 2

    key = jax.random.PRNGKey(0)
    ks = jax.random.split(key, 14)

    encoded = jax.random.normal(ks[0], (seq_len, batch, input_dim * 2), jnp.float32)

    # PyTorch nn.LSTM / nn.Linear parameter shapes, deterministic init.
    w_ih0 = 0.1 * jax.random.normal(ks[1], (4 * hidden_dim, input_dim * 2), jnp.float32)
    w_hh0 = 0.1 * jax.random.normal(ks[2], (4 * hidden_dim, hidden_dim), jnp.float32)
    b_ih0 = 0.1 * jax.random.normal(ks[3], (4 * hidden_dim,), jnp.float32)
    b_hh0 = 0.1 * jax.random.normal(ks[4], (4 * hidden_dim,), jnp.float32)

    w_ih1 = 0.1 * jax.random.normal(ks[5], (4 * hidden_dim, hidden_dim), jnp.float32)
    w_hh1 = 0.1 * jax.random.normal(ks[6], (4 * hidden_dim, hidden_dim), jnp.float32)
    b_ih1 = 0.1 * jax.random.normal(ks[7], (4 * hidden_dim,), jnp.float32)
    b_hh1 = 0.1 * jax.random.normal(ks[8], (4 * hidden_dim,), jnp.float32)

    w_fc = 0.1 * jax.random.normal(ks[9], (output_dim, 2 * hidden_dim), jnp.float32)
    b_fc = 0.1 * jax.random.normal(ks[10], (output_dim,), jnp.float32)
    w_fc2 = 0.1 * jax.random.normal(ks[11], (1, output_dim), jnp.float32)
    b_fc2 = 0.1 * jax.random.normal(ks[12], (1,), jnp.float32)

    args = (encoded, w_ih0, w_hh0, b_ih0, b_hh0, w_ih1, w_hh1, b_ih1, b_hh1,
            w_fc, b_fc, w_fc2, b_fc2)

    out = sent_regressor_pallas(*args)
    out = jax.block_until_ready(out)

    ref = sent_regressor_reference(*args)
    assert out.shape == (batch, 1), out.shape
    # Slightly looser than 1e-5: the layer-1 matmul fusion / bias folding
    # changes f32 summation order vs. the two-matmul reference.
    assert jnp.allclose(out, ref, atol=1e-4, rtol=1e-4), (out, ref)

    print("KERNEL_OK")
</pallas_src>

<mosaic_0001>
module attributes {stable_mosaic.version = 11 : i64} {
  func.func @_sent_regressor_kernel(%arg0: memref<16x32xf32, #tpu.memory_space<vmem>>, %arg1: memref<32x128xf32, #tpu.memory_space<vmem>>, %arg2: memref<32x128xf32, #tpu.memory_space<vmem>>, %arg3: memref<1x128xf32, #tpu.memory_space<vmem>>, %arg4: memref<64x128xf32, #tpu.memory_space<vmem>>, %arg5: memref<1x128xf32, #tpu.memory_space<vmem>>, %arg6: memref<32x16xf32, #tpu.memory_space<vmem>>, %arg7: memref<32x16xf32, #tpu.memory_space<vmem>>, %arg8: memref<1x16xf32, #tpu.memory_space<vmem>>, %arg9: memref<1x16xf32, #tpu.memory_space<vmem>>, %arg10: memref<1x1xf32, #tpu.memory_space<vmem>>, %arg11: memref<2x1xf32, #tpu.memory_space<vmem>>) attributes {dimension_semantics = [], scalar_prefetch = 0 : i64, scratch_operands = 0 : i64, tpu.core_type = #tpu.core_type<tc>} {
    %c0 = arith.constant 0 : index
    %c0_0 = arith.constant 0 : index
    %0 = vector.load %arg0[%c0, %c0_0] : memref<16x32xf32, #tpu.memory_space<vmem>>, vector<16x32xf32>
    %c0_1 = arith.constant 0 : index
    %c0_2 = arith.constant 0 : index
    %1 = vector.load %arg1[%c0_1, %c0_2] : memref<32x128xf32, #tpu.memory_space<vmem>>, vector<32x128xf32>
    %cst = arith.constant dense<0.000000e+00> : vector<16x128xf32>
    %2 = tpu.matmul %0, %1, %cst {dimension_numbers = #tpu.dot_dimension_numbers<[1], [0], [0], [1], [0, 0, 1, 1], [], []>} : vector<16x32xf32>, vector<32x128xf32>, vector<16x128xf32> -> vector<16x128xf32>
    %c0_3 = arith.constant 0 : index
    %c0_4 = arith.constant 0 : index
    %3 = vector.load %arg3[%c0_3, %c0_4] : memref<1x128xf32, #tpu.memory_space<vmem>>, vector<1x128xf32>
    %4 = vector.broadcast %3 : vector<1x128xf32> to vector<16x128xf32>
    %5 = arith.addf %2, %4 : vector<16x128xf32>
    %c0_5 = arith.constant 0 : index
    %c0_6 = arith.constant 0 : index
    %6 = vector.load %arg2[%c0_5, %c0_6] : memref<32x128xf32, #tpu.memory_space<vmem>>, vector<32x128xf32>
    %c0_7 = arith.constant 0 : index
    %c0_8 = arith.constant 0 : index
    %7 = vector.load %arg4[%c0_7, %c0_8] : memref<64x128xf32, #tpu.memory_space<vmem>>, vector<64x128xf32>
    %c0_9 = arith.constant 0 : index
    %c0_10 = arith.constant 0 : index
    %8 = vector.load %arg5[%c0_9, %c0_10] : memref<1x128xf32, #tpu.memory_space<vmem>>, vector<1x128xf32>
    %cst_11 = arith.constant 0.000000e+00 : f32
    %9 = vector.broadcast %cst_11 : f32 to vector<2x32xf32>
    %cst_12 = arith.constant 0.000000e+00 : f32
    %10 = vector.broadcast %cst_12 : f32 to vector<2x32xf32>
    %cst_13 = arith.constant 0.000000e+00 : f32
    %11 = vector.broadcast %cst_13 : f32 to vector<2x32xf32>
    %cst_14 = arith.constant 0.000000e+00 : f32
    %12 = vector.broadcast %cst_14 : f32 to vector<2x32xf32>
    %13 = vector.extract_strided_slice %5 {offsets = [0, 0], sizes = [2, 128], strides = [1, 1]} : vector<16x128xf32> to vector<2x128xf32>
    %cst_15 = arith.constant dense<0.000000e+00> : vector<2x128xf32>
    %14 = tpu.matmul %9, %6, %cst_15 {dimension_numbers = #tpu.dot_dimension_numbers<[1], [0], [0], [1], [0, 0, 1, 1], [], []>} : vector<2x32xf32>, vector<32x128xf32>, vector<2x128xf32> -> vector<2x128xf32>
    %15 = arith.addf %13, %14 : vector<2x128xf32>
    %16 = arith.negf %15 : vector<2x128xf32>
    %17 = math.exp %16 : vector<2x128xf32>
    %cst_16 = arith.constant 1.000000e+00 : f32
    %18 = vector.broadcast %cst_16 : f32 to vector<2x128xf32>
    %19 = arith.addf %18, %17 : vector<2x128xf32>
    %20 = arith.divf %18, %19 : vector<2x128xf32>
    %21 = math.tanh %15 : vector<2x128xf32>
    %22 = vector.extract_strided_slice %20 {offsets = [0, 0], sizes = [2, 32], strides = [1, 1]} : vector<2x128xf32> to vector<2x32xf32>
    %23 = vector.extract_strided_slice %20 {offsets = [0, 32], sizes = [2, 32], strides = [1, 1]} : vector<2x128xf32> to vector<2x32xf32>
    %24 = vector.extract_strided_slice %21 {offsets = [0, 64], sizes = [2, 32], strides = [1, 1]} : vector<2x128xf32> to vector<2x32xf32>
    %25 = vector.extract_strided_slice %20 {offsets = [0, 96], sizes = [2, 32], strides = [1, 1]} : vector<2x128xf32> to vector<2x32xf32>
    %26 = arith.mulf %23, %10 : vector<2x32xf32>
    %27 = arith.mulf %22, %24 : vector<2x32xf32>
    %28 = arith.addf %26, %27 : vector<2x32xf32>
    %29 = math.tanh %28 : vector<2x32xf32>
    %30 = arith.mulf %25, %29 : vector<2x32xf32>
    %31 = tpu.concatenate %30, %11 in 1 : vector<2x32xf32>, vector<2x32xf32> -> vector<2x64xf32>
    %cst_17 = arith.constant dense<0.000000e+00> : vector<2x128xf32>
    %32 = tpu.matmul %31, %7, %cst_17 {dimension_numbers = #tpu.dot_dimension_numbers<[1], [0], [0], [1], [0, 0, 1, 1], [], []>} : vector<2x64xf32>, vector<64x128xf32>, vector<2x128xf32> -> vector<2x128xf32>
    %33 = vector.broadcast %8 : vector<1x128xf32> to vector<2x128xf32>
    %34 = arith.addf %32, %33 : vector<2x128xf32>
    %35 = arith.negf %34 : vector<2x128xf32>
    %36 = math.exp %35 : vector<2x128xf32>
    %cst_18 = arith.constant 1.000000e+00 : f32
    %37 = vector.broadcast %cst_18 : f32 to vector<2x128xf32>
    %38 = arith.addf %37, %36 : vector<2x128xf32>
    %39 = arith.divf %37, %38 : vector<2x128xf32>
    %40 = math.tanh %34 : vector<2x128xf32>
    %41 = vector.extract_strided_slice %39 {offsets = [0, 0], sizes = [2, 32], strides = [1, 1]} : vector<2x128xf32> to vector<2x32xf32>
    %42 = vector.extract_strided_slice %39 {offsets = [0, 32], sizes = [2, 32], strides = [1, 1]} : vector<2x128xf32> to vector<2x32xf32>
    %43 = vector.extract_strided_slice %40 {offsets = [0, 64], sizes = [2, 32], strides = [1, 1]} : vector<2x128xf32> to vector<2x32xf32>
    %44 = vector.extract_strided_slice %39 {offsets = [0, 96], sizes = [2, 32], strides = [1, 1]} : vector<2x128xf32> to vector<2x32xf32>
    %45 = arith.mulf %42, %12 : vector<2x32xf32>
    %46 = arith.mulf %41, %43 : vector<2x32xf32>
    %47 = arith.addf %45, %46 : vector<2x32xf32>
    %48 = math.tanh %47 : vector<2x32xf32>
    %49 = arith.mulf %44, %48 : vector<2x32xf32>
    %50 = vector.extract_strided_slice %5 {offsets = [2, 0], sizes = [2, 128], strides = [1, 1]} : vector<16x128xf32> to vector<2x128xf32>
    %cst_19 = arith.constant dense<0.000000e+00> : vector<2x128xf32>
    %51 = tpu.matmul %30, %6, %cst_19 {dimension_numbers = #tpu.dot_dimension_numbers<[1], [0], [0], [1], [0, 0, 1, 1], [], []>} : vector<2x32xf32>, vector<32x128xf32>, vector<2x128xf32> -> vector<2x128xf32>
    %52 = arith.addf %50, %51 : vector<2x128xf32>
    %53 = arith.negf %52 : vector<2x128xf32>
    %54 = math.exp %53 : vector<2x128xf32>
    %cst_20 = arith.constant 1.000000e+00 : f32
    %55 = vector.broadcast %cst_20 : f32 to vector<2x128xf32>
    %56 = arith.addf %55, %54 : vector<2x128xf32>
    %57 = arith.divf %55, %56 : vector<2x128xf32>
    %58 = math.tanh %52 : vector<2x128xf32>
    %59 = vector.extract_strided_slice %57 {offsets = [0, 0], sizes = [2, 32], strides = [1, 1]} : vector<2x128xf32> to vector<2x32xf32>
    %60 = vector.extract_strided_slice %57 {offsets = [0, 32], sizes = [2, 32], strides = [1, 1]} : vector<2x128xf32> to vector<2x32xf32>
    %61 = vector.extract_strided_slice %58 {offsets = [0, 64], sizes = [2, 32], strides = [1, 1]} : vector<2x128xf32> to vector<2x32xf32>
    %62 = vector.extract_strided_slice %57 {offsets = [0, 96], sizes = [2, 32], strides = [1, 1]} : vector<2x128xf32> to vector<2x32xf32>
    %63 = arith.mulf %60, %28 : vector<2x32xf32>
    %64 = arith.mulf %59, %61 : vector<2x32xf32>
    %65 = arith.addf %63, %64 : vector<2x32xf32>
    %66 = math.tanh %65 : vector<2x32xf32>
    %67 = arith.mulf %62, %66 : vector<2x32xf32>
    %68 = tpu.concatenate %67, %49 in 1 : vector<2x32xf32>, vector<2x32xf32> -> vector<2x64xf32>
    %cst_21 = arith.constant dense<0.000000e+00> : vector<2x128xf32>
    %69 = tpu.matmul %68, %7, %cst_21 {dimension_numbers = #tpu.dot_dimension_numbers<[1], [0], [0], [1], [0, 0, 1, 1], [], []>} : vector<2x64xf32>, vector<64x128xf32>, vector<2x128xf32> -> vector<2x128xf32>
    %70 = vector.broadcast %8 : vector<1x128xf32> to vector<2x128xf32>
    %71 = arith.addf %69, %70 : vector<2x128xf32>
    %72 = arith.negf %71 : vector<2x128xf32>
    %73 = math.exp %72 : vector<2x128xf32>
    %cst_22 = arith.constant 1.000000e+00 : f32
    %74 = vector.broadcast %cst_22 : f32 to vector<2x128xf32>
    %75 = arith.addf %74, %73 : vector<2x128xf32>
    %76 = arith.divf %74, %75 : vector<2x128xf32>
    %77 = math.tanh %71 : vector<2x128xf32>
    %78 = vector.extract_strided_slice %76 {offsets = [0, 0], sizes = [2, 32], strides = [1, 1]} : vector<2x128xf32> to vector<2x32xf32>
    %79 = vector.extract_strided_slice %76 {offsets = [0, 32], sizes = [2, 32], strides = [1, 1]} : vector<2x128xf32> to vector<2x32xf32>
    %80 = vector.extract_strided_slice %77 {offsets = [0, 64], sizes = [2, 32], strides = [1, 1]} : vector<2x128xf32> to vector<2x32xf32>
    %81 = vector.extract_strided_slice %76 {offsets = [0, 96], sizes = [2, 32], strides = [1, 1]} : vector<2x128xf32> to vector<2x32xf32>
    %82 = arith.mulf %79, %47 : vector<2x32xf32>
    %83 = arith.mulf %78, %80 : vector<2x32xf32>
    %84 = arith.addf %82, %83 : vector<2x32xf32>
    %85 = math.tanh %84 : vector<2x32xf32>
    %86 = arith.mulf %81, %85 : vector<2x32xf32>
    %87 = vector.extract_strided_slice %5 {offsets = [4, 0], sizes = [2, 128], strides = [1, 1]} : vector<16x128xf32> to vector<2x128xf32>
    %cst_23 = arith.constant dense<0.000000e+00> : vector<2x128xf32>
    %88 = tpu.matmul %67, %6, %cst_23 {dimension_numbers = #tpu.dot_dimension_numbers<[1], [0], [0], [1], [0, 0, 1, 1], [], []>} : vector<2x32xf32>, vector<32x128xf32>, vector<2x128xf32> -> vector<2x128xf32>
    %89 = arith.addf %87, %88 : vector<2x128xf32>
    %90 = arith.negf %89 : vector<2x128xf32>
    %91 = math.exp %90 : vector<2x128xf32>
    %cst_24 = arith.constant 1.000000e+00 : f32
    %92 = vector.broadcast %cst_24 : f32 to vector<2x128xf32>
    %93 = arith.addf %92, %91 : vector<2x128xf32>
    %94 = arith.divf %92, %93 : vector<2x128xf32>
    %95 = math.tanh %89 : vector<2x128xf32>
    %96 = vector.extract_strided_slice %94 {offsets = [0, 0], sizes = [2, 32], strides = [1, 1]} : vector<2x128xf32> to vector<2x32xf32>
    %97 = vector.extract_strided_slice %94 {offsets = [0, 32], sizes = [2, 32], strides = [1, 1]} : vector<2x128xf32> to vector<2x32xf32>
    %98 = vector.extract_strided_slice %95 {offsets = [0, 64], sizes = [2, 32], strides = [1, 1]} : vector<2x128xf32> to vector<2x32xf32>
    %99 = vector.extract_strided_slice %94 {offsets = [0, 96], sizes = [2, 32], strides = [1, 1]} : vector<2x128xf32> to vector<2x32xf32>
    %100 = arith.mulf %97, %65 : vector<2x32xf32>
    %101 = arith.mulf %96, %98 : vector<2x32xf32>
    %102 = arith.addf %100, %101 : vector<2x32xf32>
    %103 = math.tanh %102 : vector<2x32xf32>
    %104 = arith.mulf %99, %103 : vector<2x32xf32>
    %105 = tpu.concatenate %104, %86 in 1 : vector<2x32xf32>, vector<2x32xf32> -> vector<2x64xf32>
    %cst_25 = arith.constant dense<0.000000e+00> : vector<2x128xf32>
    %106 = tpu.matmul %105, %7, %cst_25 {dimension_numbers = #tpu.dot_dimension_numbers<[1], [0], [0], [1], [0, 0, 1, 1], [], []>} : vector<2x64xf32>, vector<64x128xf32>, vector<2x128xf32> -> vector<2x128xf32>
    %107 = vector.broadcast %8 : vector<1x128xf32> to vector<2x128xf32>
    %108 = arith.addf %106, %107 : vector<2x128xf32>
    %109 = arith.negf %108 : vector<2x128xf32>
    %110 = math.exp %109 : vector<2x128xf32>
    %cst_26 = arith.constant 1.000000e+00 : f32
    %111 = vector.broadcast %cst_26 : f32 to vector<2x128xf32>
    %112 = arith.addf %111, %110 : vector<2x128xf32>
    %113 = arith.divf %111, %112 : vector<2x128xf32>
    %114 = math.tanh %108 : vector<2x128xf32>
    %115 = vector.extract_strided_slice %113 {offsets = [0, 0], sizes = [2, 32], strides = [1, 1]} : vector<2x128xf32> to vector<2x32xf32>
    %116 = vector.extract_strided_slice %113 {offsets = [0, 32], sizes = [2, 32], strides = [1, 1]} : vector<2x128xf32> to vector<2x32xf32>
    %117 = vector.extract_strided_slice %114 {offsets = [0, 64], sizes = [2, 32], strides = [1, 1]} : vector<2x128xf32> to vector<2x32xf32>
    %118 = vector.extract_strided_slice %113 {offsets = [0, 96], sizes = [2, 32], strides = [1, 1]} : vector<2x128xf32> to vector<2x32xf32>
    %119 = arith.mulf %116, %84 : vector<2x32xf32>
    %120 = arith.mulf %115, %117 : vector<2x32xf32>
    %121 = arith.addf %119, %120 : vector<2x32xf32>
    %122 = math.tanh %121 : vector<2x32xf32>
    %123 = arith.mulf %118, %122 : vector<2x32xf32>
    %124 = vector.extract_strided_slice %5 {offsets = [6, 0], sizes = [2, 128], strides = [1, 1]} : vector<16x128xf32> to vector<2x128xf32>
    %cst_27 = arith.constant dense<0.000000e+00> : vector<2x128xf32>
    %125 = tpu.matmul %104, %6, %cst_27 {dimension_numbers = #tpu.dot_dimension_numbers<[1], [0], [0], [1], [0, 0, 1, 1], [], []>} : vector<2x32xf32>, vector<32x128xf32>, vector<2x128xf32> -> vector<2x128xf32>
    %126 = arith.addf %124, %125 : vector<2x128xf32>
    %127 = arith.negf %126 : vector<2x128xf32>
    %128 = math.exp %127 : vector<2x128xf32>
    %cst_28 = arith.constant 1.000000e+00 : f32
    %129 = vector.broadcast %cst_28 : f32 to vector<2x128xf32>
    %130 = arith.addf %129, %128 : vector<2x128xf32>
    %131 = arith.divf %129, %130 : vector<2x128xf32>
    %132 = math.tanh %126 : vector<2x128xf32>
    %133 = vector.extract_strided_slice %131 {offsets = [0, 0], sizes = [2, 32], strides = [1, 1]} : vector<2x128xf32> to vector<2x32xf32>
    %134 = vector.extract_strided_slice %131 {offsets = [0, 32], sizes = [2, 32], strides = [1, 1]} : vector<2x128xf32> to vector<2x32xf32>
    %135 = vector.extract_strided_slice %132 {offsets = [0, 64], sizes = [2, 32], strides = [1, 1]} : vector<2x128xf32> to vector<2x32xf32>
    %136 = vector.extract_strided_slice %131 {offsets = [0, 96], sizes = [2, 32], strides = [1, 1]} : vector<2x128xf32> to vector<2x32xf32>
    %137 = arith.mulf %134, %102 : vector<2x32xf32>
    %138 = arith.mulf %133, %135 : vector<2x32xf32>
    %139 = arith.addf %137, %138 : vector<2x32xf32>
    %140 = math.tanh %139 : vector<2x32xf32>
    %141 = arith.mulf %136, %140 : vector<2x32xf32>
    %142 = tpu.concatenate %141, %123 in 1 : vector<2x32xf32>, vector<2x32xf32> -> vector<2x64xf32>
    %cst_29 = arith.constant dense<0.000000e+00> : vector<2x128xf32>
    %143 = tpu.matmul %142, %7, %cst_29 {dimension_numbers = #tpu.dot_dimension_numbers<[1], [0], [0], [1], [0, 0, 1, 1], [], []>} : vector<2x64xf32>, vector<64x128xf32>, vector<2x128xf32> -> vector<2x128xf32>
    %144 = vector.broadcast %8 : vector<1x128xf32> to vector<2x128xf32>
    %145 = arith.addf %143, %144 : vector<2x128xf32>
    %146 = arith.negf %145 : vector<2x128xf32>
    %147 = math.exp %146 : vector<2x128xf32>
    %cst_30 = arith.constant 1.000000e+00 : f32
    %148 = vector.broadcast %cst_30 : f32 to vector<2x128xf32>
    %149 = arith.addf %148, %147 : vector<2x128xf32>
    %150 = arith.divf %148, %149 : vector<2x128xf32>
    %151 = math.tanh %145 : vector<2x128xf32>
    %152 = vector.extract_strided_slice %150 {offsets = [0, 0], sizes = [2, 32], strides = [1, 1]} : vector<2x128xf32> to vector<2x32xf32>
    %153 = vector.extract_strided_slice %150 {offsets = [0, 32], sizes = [2, 32], strides = [1, 1]} : vector<2x128xf32> to vector<2x32xf32>
    %154 = vector.extract_strided_slice %151 {offsets = [0, 64], sizes = [2, 32], strides = [1, 1]} : vector<2x128xf32> to vector<2x32xf32>
    %155 = vector.extract_strided_slice %150 {offsets = [0, 96], sizes = [2, 32], strides = [1, 1]} : vector<2x128xf32> to vector<2x32xf32>
    %156 = arith.mulf %153, %121 : vector<2x32xf32>
    %157 = arith.mulf %152, %154 : vector<2x32xf32>
    %158 = arith.addf %156, %157 : vector<2x32xf32>
    %159 = math.tanh %158 : vector<2x32xf32>
    %160 = arith.mulf %155, %159 : vector<2x32xf32>
    %161 = vector.extract_strided_slice %5 {offsets = [8, 0], sizes = [2, 128], strides = [1, 1]} : vector<16x128xf32> to vector<2x128xf32>
    %cst_31 = arith.constant dense<0.000000e+00> : vector<2x128xf32>
    %162 = tpu.matmul %141, %6, %cst_31 {dimension_numbers = #tpu.dot_dimension_numbers<[1], [0], [0], [1], [0, 0, 1, 1], [], []>} : vector<2x32xf32>, vector<32x128xf32>, vector<2x128xf32> -> vector<2x128xf32>
    %163 = arith.addf %161, %162 : vector<2x128xf32>
    %164 = arith.negf %163 : vector<2x128xf32>
    %165 = math.exp %164 : vector<2x128xf32>
    %cst_32 = arith.constant 1.000000e+00 : f32
    %166 = vector.broadcast %cst_32 : f32 to vector<2x128xf32>
    %167 = arith.addf %166, %165 : vector<2x128xf32>
    %168 = arith.divf %166, %167 : vector<2x128xf32>
    %169 = math.tanh %163 : vector<2x128xf32>
    %170 = vector.extract_strided_slice %168 {offsets = [0, 0], sizes = [2, 32], strides = [1, 1]} : vector<2x128xf32> to vector<2x32xf32>
    %171 = vector.extract_strided_slice %168 {offsets = [0, 32], sizes = [2, 32], strides = [1, 1]} : vector<2x128xf32> to vector<2x32xf32>
    %172 = vector.extract_strided_slice %169 {offsets = [0, 64], sizes = [2, 32], strides = [1, 1]} : vector<2x128xf32> to vector<2x32xf32>
    %173 = vector.extract_strided_slice %168 {offsets = [0, 96], sizes = [2, 32], strides = [1, 1]} : vector<2x128xf32> to vector<2x32xf32>
    %174 = arith.mulf %171, %139 : vector<2x32xf32>
    %175 = arith.mulf %170, %172 : vector<2x32xf32>
    %176 = arith.addf %174, %175 : vector<2x32xf32>
    %177 = math.tanh %176 : vector<2x32xf32>
    %178 = arith.mulf %173, %177 : vector<2x32xf32>
    %179 = tpu.concatenate %178, %160 in 1 : vector<2x32xf32>, vector<2x32xf32> -> vector<2x64xf32>
    %cst_33 = arith.constant dense<0.000000e+00> : vector<2x128xf32>
    %180 = tpu.matmul %179, %7, %cst_33 {dimension_numbers = #tpu.dot_dimension_numbers<[1], [0], [0], [1], [0, 0, 1, 1], [], []>} : vector<2x64xf32>, vector<64x128xf32>, vector<2x128xf32> -> vector<2x128xf32>
    %181 = vector.broadcast %8 : vector<1x128xf32> to vector<2x128xf32>
    %182 = arith.addf %180, %181 : vector<2x128xf32>
    %183 = arith.negf %182 : vector<2x128xf32>
    %184 = math.exp %183 : vector<2x128xf32>
    %cst_34 = arith.constant 1.000000e+00 : f32
    %185 = vector.broadcast %cst_34 : f32 to vector<2x128xf32>
    %186 = arith.addf %185, %184 : vector<2x128xf32>
    %187 = arith.divf %185, %186 : vector<2x128xf32>
    %188 = math.tanh %182 : vector<2x128xf32>
    %189 = vector.extract_strided_slice %187 {offsets = [0, 0], sizes = [2, 32], strides = [1, 1]} : vector<2x128xf32> to vector<2x32xf32>
    %190 = vector.extract_strided_slice %187 {offsets = [0, 32], sizes = [2, 32], strides = [1, 1]} : vector<2x128xf32> to vector<2x32xf32>
    %191 = vector.extract_strided_slice %188 {offsets = [0, 64], sizes = [2, 32], strides = [1, 1]} : vector<2x128xf32> to vector<2x32xf32>
    %192 = vector.extract_strided_slice %187 {offsets = [0, 96], sizes = [2, 32], strides = [1, 1]} : vector<2x128xf32> to vector<2x32xf32>
    %193 = arith.mulf %190, %158 : vector<2x32xf32>
    %194 = arith.mulf %189, %191 : vector<2x32xf32>
    %195 = arith.addf %193, %194 : vector<2x32xf32>
    %196 = math.tanh %195 : vector<2x32xf32>
    %197 = arith.mulf %192, %196 : vector<2x32xf32>
    %198 = vector.extract_strided_slice %5 {offsets = [10, 0], sizes = [2, 128], strides = [1, 1]} : vector<16x128xf32> to vector<2x128xf32>
    %cst_35 = arith.constant dense<0.000000e+00> : vector<2x128xf32>
    %199 = tpu.matmul %178, %6, %cst_35 {dimension_numbers = #tpu.dot_dimension_numbers<[1], [0], [0], [1], [0, 0, 1, 1], [], []>} : vector<2x32xf32>, vector<32x128xf32>, vector<2x128xf32> -> vector<2x128xf32>
    %200 = arith.addf %198, %199 : vector<2x128xf32>
    %201 = arith.negf %200 : vector<2x128xf32>
    %202 = math.exp %201 : vector<2x128xf32>
    %cst_36 = arith.constant 1.000000e+00 : f32
    %203 = vector.broadcast %cst_36 : f32 to vector<2x128xf32>
    %204 = arith.addf %203, %202 : vector<2x128xf32>
    %205 = arith.divf %203, %204 : vector<2x128xf32>
    %206 = math.tanh %200 : vector<2x128xf32>
    %207 = vector.extract_strided_slice %205 {offsets = [0, 0], sizes = [2, 32], strides = [1, 1]} : vector<2x128xf32> to vector<2x32xf32>
    %208 = vector.extract_strided_slice %205 {offsets = [0, 32], sizes = [2, 32], strides = [1, 1]} : vector<2x128xf32> to vector<2x32xf32>
    %209 = vector.extract_strided_slice %206 {offsets = [0, 64], sizes = [2, 32], strides = [1, 1]} : vector<2x128xf32> to vector<2x32xf32>
    %210 = vector.extract_strided_slice %205 {offsets = [0, 96], sizes = [2, 32], strides = [1, 1]} : vector<2x128xf32> to vector<2x32xf32>
    %211 = arith.mulf %208, %176 : vector<2x32xf32>
    %212 = arith.mulf %207, %209 : vector<2x32xf32>
    %213 = arith.addf %211, %212 : vector<2x32xf32>
    %214 = math.tanh %213 : vector<2x32xf32>
    %215 = arith.mulf %210, %214 : vector<2x32xf32>
    %216 = tpu.concatenate %215, %197 in 1 : vector<2x32xf32>, vector<2x32xf32> -> vector<2x64xf32>
    %cst_37 = arith.constant dense<0.000000e+00> : vector<2x128xf32>
    %217 = tpu.matmul %216, %7, %cst_37 {dimension_numbers = #tpu.dot_dimension_numbers<[1], [0], [0], [1], [0, 0, 1, 1], [], []>} : vector<2x64xf32>, vector<64x128xf32>, vector<2x128xf32> -> vector<2x128xf32>
    %218 = vector.broadcast %8 : vector<1x128xf32> to vector<2x128xf32>
    %219 = arith.addf %217, %218 : vector<2x128xf32>
    %220 = arith.negf %219 : vector<2x128xf32>
    %221 = math.exp %220 : vector<2x128xf32>
    %cst_38 = arith.constant 1.000000e+00 : f32
    %222 = vector.broadcast %cst_38 : f32 to vector<2x128xf32>
    %223 = arith.addf %222, %221 : vector<2x128xf32>
    %224 = arith.divf %222, %223 : vector<2x128xf32>
    %225 = math.tanh %219 : vector<2x128xf32>
    %226 = vector.extract_strided_slice %224 {offsets = [0, 0], sizes = [2, 32], strides = [1, 1]} : vector<2x128xf32> to vector<2x32xf32>
    %227 = vector.extract_strided_slice %224 {offsets = [0, 32], sizes = [2, 32], strides = [1, 1]} : vector<2x128xf32> to vector<2x32xf32>
    %228 = vector.extract_strided_slice %225 {offsets = [0, 64], sizes = [2, 32], strides = [1, 1]} : vector<2x128xf32> to vector<2x32xf32>
    %229 = vector.extract_strided_slice %224 {offsets = [0, 96], sizes = [2, 32], strides = [1, 1]} : vector<2x128xf32> to vector<2x32xf32>
    %230 = arith.mulf %227, %195 : vector<2x32xf32>
    %231 = arith.mulf %226, %228 : vector<2x32xf32>
    %232 = arith.addf %230, %231 : vector<2x32xf32>
    %233 = math.tanh %232 : vector<2x32xf32>
    %234 = arith.mulf %229, %233 : vector<2x32xf32>
    %235 = vector.extract_strided_slice %5 {offsets = [12, 0], sizes = [2, 128], strides = [1, 1]} : vector<16x128xf32> to vector<2x128xf32>
    %cst_39 = arith.constant dense<0.000000e+00> : vector<2x128xf32>
    %236 = tpu.matmul %215, %6, %cst_39 {dimension_numbers = #tpu.dot_dimension_numbers<[1], [0], [0], [1], [0, 0, 1, 1], [], []>} : vector<2x32xf32>, vector<32x128xf32>, vector<2x128xf32> -> vector<2x128xf32>
    %237 = arith.addf %235, %236 : vector<2x128xf32>
    %238 = arith.negf %237 : vector<2x128xf32>
    %239 = math.exp %238 : vector<2x128xf32>
    %cst_40 = arith.constant 1.000000e+00 : f32
    %240 = vector.broadcast %cst_40 : f32 to vector<2x128xf32>
    %241 = arith.addf %240, %239 : vector<2x128xf32>
    %242 = arith.divf %240, %241 : vector<2x128xf32>
    %243 = math.tanh %237 : vector<2x128xf32>
    %244 = vector.extract_strided_slice %242 {offsets = [0, 0], sizes = [2, 32], strides = [1, 1]} : vector<2x128xf32> to vector<2x32xf32>
    %245 = vector.extract_strided_slice %242 {offsets = [0, 32], sizes = [2, 32], strides = [1, 1]} : vector<2x128xf32> to vector<2x32xf32>
    %246 = vector.extract_strided_slice %243 {offsets = [0, 64], sizes = [2, 32], strides = [1, 1]} : vector<2x128xf32> to vector<2x32xf32>
    %247 = vector.extract_strided_slice %242 {offsets = [0, 96], sizes = [2, 32], strides = [1, 1]} : vector<2x128xf32> to vector<2x32xf32>
    %248 = arith.mulf %245, %213 : vector<2x32xf32>
    %249 = arith.mulf %244, %246 : vector<2x32xf32>
    %250 = arith.addf %248, %249 : vector<2x32xf32>
    %251 = math.tanh %250 : vector<2x32xf32>
    %252 = arith.mulf %247, %251 : vector<2x32xf32>
    %253 = tpu.concatenate %252, %234 in 1 : vector<2x32xf32>, vector<2x32xf32> -> vector<2x64xf32>
    %cst_41 = arith.constant dense<0.000000e+00> : vector<2x128xf32>
    %254 = tpu.matmul %253, %7, %cst_41 {dimension_numbers = #tpu.dot_dimension_numbers<[1], [0], [0], [1], [0, 0, 1, 1], [], []>} : vector<2x64xf32>, vector<64x128xf32>, vector<2x128xf32> -> vector<2x128xf32>
    %255 = vector.broadcast %8 : vector<1x128xf32> to vector<2x128xf32>
    %256 = arith.addf %254, %255 : vector<2x128xf32>
    %257 = arith.negf %256 : vector<2x128xf32>
    %258 = math.exp %257 : vector<2x128xf32>
    %cst_42 = arith.constant 1.000000e+00 : f32
    %259 = vector.broadcast %cst_42 : f32 to vector<2x128xf32>
    %260 = arith.addf %259, %258 : vector<2x128xf32>
    %261 = arith.divf %259, %260 : vector<2x128xf32>
    %262 = math.tanh %256 : vector<2x128xf32>
    %263 = vector.extract_strided_slice %261 {offsets = [0, 0], sizes = [2, 32], strides = [1, 1]} : vector<2x128xf32> to vector<2x32xf32>
    %264 = vector.extract_strided_slice %261 {offsets = [0, 32], sizes = [2, 32], strides = [1, 1]} : vector<2x128xf32> to vector<2x32xf32>
    %265 = vector.extract_strided_slice %262 {offsets = [0, 64], sizes = [2, 32], strides = [1, 1]} : vector<2x128xf32> to vector<2x32xf32>
    %266 = vector.extract_strided_slice %261 {offsets = [0, 96], sizes = [2, 32], strides = [1, 1]} : vector<2x128xf32> to vector<2x32xf32>
    %267 = arith.mulf %264, %232 : vector<2x32xf32>
    %268 = arith.mulf %263, %265 : vector<2x32xf32>
    %269 = arith.addf %267, %268 : vector<2x32xf32>
    %270 = math.tanh %269 : vector<2x32xf32>
    %271 = arith.mulf %266, %270 : vector<2x32xf32>
    %272 = vector.extract_strided_slice %5 {offsets = [14, 0], sizes = [2, 128], strides = [1, 1]} : vector<16x128xf32> to vector<2x128xf32>
    %cst_43 = arith.constant dense<0.000000e+00> : vector<2x128xf32>
    %273 = tpu.matmul %252, %6, %cst_43 {dimension_numbers = #tpu.dot_dimension_numbers<[1], [0], [0], [1], [0, 0, 1, 1], [], []>} : vector<2x32xf32>, vector<32x128xf32>, vector<2x128xf32> -> vector<2x128xf32>
    %274 = arith.addf %272, %273 : vector<2x128xf32>
    %275 = arith.negf %274 : vector<2x128xf32>
    %276 = math.exp %275 : vector<2x128xf32>
    %cst_44 = arith.constant 1.000000e+00 : f32
    %277 = vector.broadcast %cst_44 : f32 to vector<2x128xf32>
    %278 = arith.addf %277, %276 : vector<2x128xf32>
    %279 = arith.divf %277, %278 : vector<2x128xf32>
    %280 = math.tanh %274 : vector<2x128xf32>
    %281 = vector.extract_strided_slice %279 {offsets = [0, 0], sizes = [2, 32], strides = [1, 1]} : vector<2x128xf32> to vector<2x32xf32>
    %282 = vector.extract_strided_slice %279 {offsets = [0, 32], sizes = [2, 32], strides = [1, 1]} : vector<2x128xf32> to vector<2x32xf32>
    %283 = vector.extract_strided_slice %280 {offsets = [0, 64], sizes = [2, 32], strides = [1, 1]} : vector<2x128xf32> to vector<2x32xf32>
    %284 = vector.extract_strided_slice %279 {offsets = [0, 96], sizes = [2, 32], strides = [1, 1]} : vector<2x128xf32> to vector<2x32xf32>
    %285 = arith.mulf %282, %250 : vector<2x32xf32>
    %286 = arith.mulf %281, %283 : vector<2x32xf32>
    %287 = arith.addf %285, %286 : vector<2x32xf32>
    %288 = math.tanh %287 : vector<2x32xf32>
    %289 = arith.mulf %284, %288 : vector<2x32xf32>
    %290 = tpu.concatenate %289, %271 in 1 : vector<2x32xf32>, vector<2x32xf32> -> vector<2x64xf32>
    %cst_45 = arith.constant dense<0.000000e+00> : vector<2x128xf32>
    %291 = tpu.matmul %290, %7, %cst_45 {dimension_numbers = #tpu.dot_dimension_numbers<[1], [0], [0], [1], [0, 0, 1, 1], [], []>} : vector<2x64xf32>, vector<64x128xf32>, vector<2x128xf32> -> vector<2x128xf32>
    %292 = vector.broadcast %8 : vector<1x128xf32> to vector<2x128xf32>
    %293 = arith.addf %291, %292 : vector<2x128xf32>
    %294 = arith.negf %293 : vector<2x128xf32>
    %295 = math.exp %294 : vector<2x128xf32>
    %cst_46 = arith.constant 1.000000e+00 : f32
    %296 = vector.broadcast %cst_46 : f32 to vector<2x128xf32>
    %297 = arith.addf %296, %295 : vector<2x128xf32>
    %298 = arith.divf %296, %297 : vector<2x128xf32>
    %299 = math.tanh %293 : vector<2x128xf32>
    %300 = vector.extract_strided_slice %298 {offsets = [0, 0], sizes = [2, 32], strides = [1, 1]} : vector<2x128xf32> to vector<2x32xf32>
    %301 = vector.extract_strided_slice %298 {offsets = [0, 32], sizes = [2, 32], strides = [1, 1]} : vector<2x128xf32> to vector<2x32xf32>
    %302 = vector.extract_strided_slice %299 {offsets = [0, 64], sizes = [2, 32], strides = [1, 1]} : vector<2x128xf32> to vector<2x32xf32>
    %303 = vector.extract_strided_slice %298 {offsets = [0, 96], sizes = [2, 32], strides = [1, 1]} : vector<2x128xf32> to vector<2x32xf32>
    %304 = arith.mulf %301, %269 : vector<2x32xf32>
    %305 = arith.mulf %300, %302 : vector<2x32xf32>
    %306 = arith.addf %304, %305 : vector<2x32xf32>
    %307 = math.tanh %306 : vector<2x32xf32>
    %308 = arith.mulf %303, %307 : vector<2x32xf32>
    %c0_47 = arith.constant 0 : index
    %c0_48 = arith.constant 0 : index
    %309 = vector.load %arg6[%c0_47, %c0_48] : memref<32x16xf32, #tpu.memory_space<vmem>>, vector<32x16xf32>
    %cst_49 = arith.constant dense<0.000000e+00> : vector<2x16xf32>
    %310 = tpu.matmul %289, %309, %cst_49 {dimension_numbers = #tpu.dot_dimension_numbers<[1], [0], [0], [1], [0, 0, 1, 1], [], []>} : vector<2x32xf32>, vector<32x16xf32>, vector<2x16xf32> -> vector<2x16xf32>
    %c0_50 = arith.constant 0 : index
    %c0_51 = arith.constant 0 : index
    %311 = vector.load %arg7[%c0_50, %c0_51] : memref<32x16xf32, #tpu.memory_space<vmem>>, vector<32x16xf32>
    %cst_52 = arith.constant dense<0.000000e+00> : vector<2x16xf32>
    %312 = tpu.matmul %308, %311, %cst_52 {dimension_numbers = #tpu.dot_dimension_numbers<[1], [0], [0], [1], [0, 0, 1, 1], [], []>} : vector<2x32xf32>, vector<32x16xf32>, vector<2x16xf32> -> vector<2x16xf32>
    %313 = arith.addf %310, %312 : vector<2x16xf32>
    %c0_53 = arith.constant 0 : index
    %c0_54 = arith.constant 0 : index
    %314 = vector.load %arg8[%c0_53, %c0_54] : memref<1x16xf32, #tpu.memory_space<vmem>>, vector<1x16xf32>
    %315 = vector.broadcast %314 : vector<1x16xf32> to vector<2x16xf32>
    %316 = arith.addf %313, %315 : vector<2x16xf32>
    %cst_55 = arith.constant 0.000000e+00 : f32
    %317 = vector.broadcast %cst_55 : f32 to vector<2x16xf32>
    %318 = arith.maximumf %316, %317 : vector<2x16xf32>
    %c0_56 = arith.constant 0 : index
    %c0_57 = arith.constant 0 : index
    %319 = vector.load %arg9[%c0_56, %c0_57] : memref<1x16xf32, #tpu.memory_space<vmem>>, vector<1x16xf32>
    %320 = vector.broadcast %319 : vector<1x16xf32> to vector<2x16xf32>
    %321 = arith.mulf %318, %320 : vector<2x16xf32>
    %cst_58 = arith.constant dense<0.000000e+00> : vector<2xf32>
    %322 = vector.multi_reduction <add>, %321, %cst_58 [1] : vector<2x16xf32> to vector<2xf32>
    %323 = vector.shape_cast %322 : vector<2xf32> to vector<2x1xf32>
    %c0_59 = arith.constant 0 : index
    %c0_60 = arith.constant 0 : index
    %324 = vector.load %arg10[%c0_59, %c0_60] : memref<1x1xf32, #tpu.memory_space<vmem>>, vector<1x1xf32>
    %325 = vector.broadcast %324 : vector<1x1xf32> to vector<2x1xf32>
    %326 = arith.addf %323, %325 : vector<2x1xf32>
    %c0_61 = arith.constant 0 : index
    %c0_62 = arith.constant 0 : index
    %327 = vector.load %arg11[%c0_61, %c0_62] : memref<2x1xf32, #tpu.memory_space<vmem>>, vector<2x1xf32>
    tpu.vector_store %arg11[%c0_61, %c0_62], %326 {strides = array<i32>} : memref<2x1xf32, #tpu.memory_space<vmem>>, vector<2x1xf32>,
    return
  }
}

</mosaic_0001>

<bundles_post_ra>
// kernel: sent_regressor_pallas.1
= control target key start
LH: loop header
LB: loop body
LE: loop exit
PB: predicated region body
PF: predicated region fallthrough
CT: control target
= control target key end

     0   :  { %vm50_vm0 = vcmask 261120   ;;  %v1448_v9 = vmov 0.0   ;;  %s1449_s16 = smov 64   ;;  %vm162_vm5 = vcmask 523264   ;;  %s1910_s1 = inlined_call_operand.vmem [shape: f32[32,128], index: 1, kind: input, shape index: {}]   ;;  %s1911_s2 = inlined_call_operand.vmem [shape: f32[32,128], index: 2, kind: input, shape index: {}]   ;;  %s1912_s0 = inlined_call_operand.vmem [shape: f32[16,32], index: 0, kind: input, shape index: {}]   ;;  %s1913_s3 = inlined_call_operand.vmem [shape: f32[1,128], index: 3, kind: input, shape index: {}]   ;;  %s1914_s4 = inlined_call_operand.vmem [shape: f32[64,128], index: 4, kind: input, shape index: {}]   ;;  %s1915_s5 = inlined_call_operand.vmem [shape: f32[1,128], index: 5, kind: input, shape index: {}]   ;;  %s1916_s6 = inlined_call_operand.vmem [shape: f32[32,16], index: 6, kind: input, shape index: {}]   ;;  %s1917_s8 = inlined_call_operand.vmem [shape: f32[1,16], index: 8, kind: input, shape index: {}]   ;;  %s1918_s7 = inlined_call_operand.vmem [shape: f32[32,16], index: 7, kind: input, shape index: {}]   ;;  %s1919_s9 = inlined_call_operand.vmem [shape: f32[1,16], index: 9, kind: input, shape index: {}]   ;;  %s1920_s10 = inlined_call_operand.<no memory space> [shape: f32[1,1], index: 10, kind: input, shape index: {}]   ;;  %s1921_s11 = inlined_call_operand.vmem [shape: f32[2,1], index: 11, kind: output, shape index: {}]  }
   0x1   :  { %v45_v0 = vld [vmem:[%s1910_s1 + $0x18] sm:$0xff]  ;;  %v44_v1 = vld [vmem:[%s1910_s1 + $0x10] sm:$0xff]  ;;  %v43_v4 = vld [vmem:[%s1910_s1 + $0x8] sm:$0xff] }
   0x2   :  { %v1520_v2 = vld [vmem:[%s1911_s2 + $0x18] sm:$0xff]  ;;  %69 = vmatpush.msra.mxu0 %v45_v0  ;;  %v1526_v3 = vld [vmem:[%s1911_s2 + $0x10] sm:$0xff]  ;;  %v1534_v5 = vld [vmem:[%s1911_s2 + $0x8] sm:$0xff] }
   0x3   :  { %108 = vmatpush.msra.mxu1 %v1520_v2  ;;  %237 = vmatpush.msra.mxu3 %v1520_v2  ;;  %v42_v6 = vld [vmem:[%s1910_s1] sm:$0xff]  ;;  %v1581_v35 = vld [vmem:[%s1914_s4 + $0x38] sm:$0xff]  ;;  %v1586_v36 = vld [vmem:[%s1914_s4 + $0x30] sm:$0xff] }
   0x4   :  { %70 = vmatpush.msra.mxu0 %v44_v1  ;;  %v1544_v7 = vld [vmem:[%s1911_s2] sm:$0xff]  ;;  %174 = vmatpush.msra.mxu2 %v1581_v35  ;;  %v1593_v37 = vld [vmem:[%s1914_s4 + $0x28] sm:$0xff]  ;;  %v1609_v39 = vld [vmem:[%s1914_s4 + $0x18] sm:$0xff] }
   0x5   :  { %109 = vmatpush.msra.mxu1 %v1526_v3  ;;  %238 = vmatpush.msra.mxu3 %v1526_v3  ;;  %v40_v8 = vld [vmem:[%s1912_s0] sm:$0xff]  ;;  %v1617_v40 = vld [vmem:[%s1914_s4 + $0x10] sm:$0xff]  ;;  %v1625_v41 = vld [vmem:[%s1914_s4 + $0x8] sm:$0xff] }
   0x6   :  { %71 = vmatpush.msra.mxu0 %v43_v4  ;;  %v1566_v10 = vld [vmem:[%s1913_s3] ss:$0 sm:$0xff]  ;;  %s1450_s3 = smov 32   ;;  %175 = vmatpush.msra.mxu2 %v1586_v36 }
   0x7   :  { %110 = vmatpush.msra.mxu1 %v1534_v5  ;;  %239 = vmatpush.msra.mxu3 %v1534_v5  ;;  %v1601_v38 = vld [vmem:[%s1914_s4 + $0x20] sm:$0xff] }
   0x8   :  { %72 = vmatpush.msra.mxu0 %v42_v6  ;;  %176 = vmatpush.msra.mxu2 %v1593_v37  ;;  %v1638_v44 = vld [vmem:[%s1914_s4] sm:$0xff] }
   0x9   :  { %111 = vmatpush.msra.mxu1 %v1544_v7  ;;  %1276 = vmatmul.msk.f32.vlgmr.msra.gmra.mxu0 %vm50_vm0, %v40_v8  ;;  %v1669_v47 = vld [vmem:[%s1915_s5] ss:$0 sm:$0xff] }
   0xa   :  { %112 = vmatmul.f32.vlgmr.msra.gmra.mxu1 %v1448_v9  ;;  %240 = vmatpush.msra.mxu3 %v1544_v7 }
   0xb   :  { %377 = vmatpush.msrb.mxu1 %v1520_v2  ;;  %311 = vmatpush.msrb.mxu0 %v1581_v35 }
   0xc   :  { %451 = vmatpush.msrb.mxu3 %v1581_v35  ;;  %177 = vmatpush.msra.mxu2 %v1601_v38 }
   0xd   :  { %378 = vmatpush.msrb.mxu1 %v1526_v3  ;;  %312 = vmatpush.msrb.mxu0 %v1586_v36 }
   0xe   :  { %452 = vmatpush.msrb.mxu3 %v1586_v36  ;;  %178 = vmatpush.msra.mxu2 %v1609_v39 }
   0xf   :  { %379 = vmatpush.msrb.mxu1 %v1534_v5  ;;  %313 = vmatpush.msrb.mxu0 %v1593_v37 }
  0x10   :  { %453 = vmatpush.msrb.mxu3 %v1593_v37  ;;  %179 = vmatpush.msra.mxu2 %v1617_v40 }
  0x11   :  { %380 = vmatpush.msrb.mxu1 %v1544_v7  ;;  %314 = vmatpush.msrb.mxu0 %v1601_v38 }
  0x12   :  { %454 = vmatpush.msrb.mxu3 %v1601_v38  ;;  %180 = vmatpush.msra.mxu2 %v1625_v41 }
  0x13   :  { %517 = vmatpush.msra.mxu1 %v1520_v2  ;;  %315 = vmatpush.msrb.mxu0 %v1609_v39 }
  0x14   :  { %455 = vmatpush.msrb.mxu3 %v1609_v39  ;;  %181 = vmatpush.msra.mxu2 %v1638_v44 }
  0x15   :  { %518 = vmatpush.msra.mxu1 %v1526_v3  ;;  %316 = vmatpush.msrb.mxu0 %v1617_v40 }
  0x16   :  { %456 = vmatpush.msrb.mxu3 %v1617_v40  ;;  %591 = vmatpush.msrb.mxu2 %v1581_v35 }
  0x17   :  { %519 = vmatpush.msra.mxu1 %v1534_v5  ;;  %317 = vmatpush.msrb.mxu0 %v1625_v41 }
  0x18   :  { %457 = vmatpush.msrb.mxu3 %v1625_v41  ;;  %592 = vmatpush.msrb.mxu2 %v1586_v36 }
  0x19   :  { %520 = vmatpush.msra.mxu1 %v1544_v7  ;;  %318 = vmatpush.msrb.mxu0 %v1638_v44 }
  0x1a   :  { %458 = vmatpush.msrb.mxu3 %v1638_v44  ;;  %593 = vmatpush.msrb.mxu2 %v1593_v37 }
  0x1b   :  { %657 = vmatpush.msra.mxu0 %v1520_v2 }
  0x1c   :  { %594 = vmatpush.msrb.mxu2 %v1601_v38 }
  0x1d   :  { %658 = vmatpush.msra.mxu0 %v1526_v3 }
  0x1e   :  { %595 = vmatpush.msrb.mxu2 %v1609_v39 }
  0x1f   :  { %659 = vmatpush.msra.mxu0 %v1534_v5 }
  0x20   :  { %596 = vmatpush.msrb.mxu2 %v1617_v40 }
  0x21   :  { %660 = vmatpush.msra.mxu0 %v1544_v7 }
  0x22   :  { %597 = vmatpush.msrb.mxu2 %v1625_v41 }
  0x24   :  { %598 = vmatpush.msrb.mxu2 %v1638_v44 }
  0x86   :  { %v74_v11 = vpop.f32.mrf.mxu0 }
  0x87   :  { %v113_v12 = vpop.f32.mrf.mxu1  ;;  %v1569_v13 = vadd.f32 %v1566_v10, %v74_v11 }
  0x89   :  { %v116_v14 = vadd.f32 %v113_v12, %v1569_v13 }
  0x8b   :  { %1319 = vtanh.f32 %v116_v14  ;;  %v1278_v16 = vmul.f32 -1.442695, %v116_v14 }
  0x8d   :  { %1321 = vpow2.f32 %v1278_v16 }
  0x91   :  { %v1320_v15 = vpop.eup %1319 }
  0x92   :  { %139 = vrot.lane.b32.xlu0 %v1320_v15, %s1449_s16 }
  0x93   :  { %v1322_v17 = vpop.eup %1321 }
  0x94   :  { %v120_v18 = vadd.f32 1.0, %v1322_v17 }
  0x96   :  { %1323 = vrcp.f32 %v120_v18  ;;  %v132_v24 = vand.u32 2147483648, %v120_v18  ;;  %vm126_vm2 = vweird.f32 %v120_v18  ;;  %v130_v25 = vand.u32 2147483647, %v120_v18 }
  0x98   :  { %v133_v27 = vor.u32 1.1754944e-38, %v132_v24  ;;  %vm131_vm4 = vcmp.eq.f32.partialorder %v130_v25, 8.507059e+37 }
  0x9c   :  { %v1324_v19 = vpop.eup %1323 }
  0x9d   :  { %v122_v20 = vmul.f32 %v1324_v19, %v120_v18  ;;  %vm127_vm1 = vweird.f32 %v1324_v19 }
  0x9e   :  { %vm128_vm3 = vmor %vm126_vm2, %vm127_vm1 }
  0x9f   :  { %v123_v21 = vsub.f32 1.0, %v122_v20 }
  0xa1   :  { %v124_v22 = vmul.f32 %v1324_v19, %v123_v21 }
  0xa3   :  { %v125_v23 = vadd.f32 %v1324_v19, %v124_v22 }
  0xa5   :  { %v129_v26 = vsel %vm128_vm3, %v1324_v19, %v125_v23 }
  0xa6   :  { %v134_v29 = vsel %vm131_vm4, %v133_v27, %v129_v26 }
  0xa7   :  { %v137_v31 = vmul.f32 0.0, %v134_v29 }
 0x104   :  { %v140_v28 = vpop.permute.xlu0 %139 }
 0x105   :  { %v142_v30 = vmul.f32 %v140_v28, %v134_v29 }
 0x107   :  { %144 = vrot.lane.b32.xlu0 %v142_v30, %s1450_s3 }
 0x179   :  { %v145_v32 = vpop.permute.xlu0 %144 }
 0x17a   :  { %v1574_v33 = vadd.f32 %v145_v32, %v137_v31 }
 0x17c   :  { %1325 = vtanh.f32 %v1574_v33  ;;  %v270_v30 = vrot.slane %v1574_v33, 6 }
 0x182   :  { %v1326_v34 = vpop.eup %1325 }
 0x183   :  { %150 = vrot.lane.b32.xlu1 %v1326_v34, %s1449_s16 }
 0x1f5   :  { %v151_v42 = vpop.permute.xlu1 %150 }
 0x1f6   :  { %v153_v43 = vmul.f32 %v151_v42, %v134_v29 }
 0x1f8   :  { %155 = vrot.lane.b32.xlu1 %v153_v43, %s1450_s3 }
 0x26a   :  { %v156_v45 = vpop.permute.xlu1 %155 }
 0x26b   :  { %1281 = vmatmul.msk.f32.vlgmr.msra.gmra.mxu3 %vm50_vm0, %v156_v45  ;;  %v158_v46 = vsel %vm50_vm0, %v156_v45, 0.0 }
 0x26c   :  { %1279 = vmatmul.msk.f32.vlgmr.msra.gmra.mxu2 %vm162_vm5, %v158_v46  ;;  %789 = vmatpush.msra.mxu3 %v1520_v2 }
 0x26d   :  { %929 = vmatpush.msra.mxu2 %v1520_v2 }
 0x26e   :  { %790 = vmatpush.msra.mxu3 %v1526_v3 }
 0x26f   :  { %930 = vmatpush.msra.mxu2 %v1526_v3 }
 0x270   :  { %791 = vmatpush.msra.mxu3 %v1534_v5 }
 0x271   :  { %931 = vmatpush.msra.mxu2 %v1534_v5 }
 0x272   :  { %792 = vmatpush.msra.mxu3 %v1544_v7 }
 0x273   :  { %932 = vmatpush.msra.mxu2 %v1544_v7 }
 0x2ee   :  { %v242_v48 = vpop.f32.mrf.mxu3 }
 0x2ef   :  { %v183_v49 = vpop.f32.mrf.mxu2  ;;  %v246_v51 = vrot.slane %v242_v48, 6 }
 0x2f0   :  { %v184_v50 = vadd.f32 %v1669_v47, %v183_v49 }
 0x2f1   :  { %v248_v52 = vadd.f32 %v246_v51, %v1569_v13  ;;  %v41_v51 = vld [vmem:[%s1912_s0 + $0x8] sm:$0xff] }
 0x2f2   :  { %1327 = vtanh.f32 %v184_v50  ;;  %v1280_v55 = vmul.f32 -1.442695, %v184_v50  ;;  %1277 = vmatmul.msk.f32.gmra.mxu0 %vm50_vm0, %v41_v51 }
 0x2f3   :  { %1329 = vtanh.f32 %v248_v52  ;;  %v1282_v56 = vmul.f32 -1.442695, %v248_v52 }
 0x2f4   :  { %1331 = vpow2.f32 %v1280_v55 }
 0x2f5   :  { %1333 = vpow2.f32 %v1282_v56 }
 0x2f8   :  { %v1328_v53 = vpop.eup %1327 }
 0x2f9   :  { %208 = vrot.lane.b32.xlu2 %v1328_v53, %s1449_s16  ;;  %v1330_v54 = vpop.eup %1329 }
 0x2fa   :  { %v1332_v57 = vpop.eup %1331 }
 0x2fb   :  { %v189_v58 = vadd.f32 1.0, %v1332_v57  ;;  %v1334_v59 = vpop.eup %1333 }
 0x2fc   :  { %v252_v60 = vadd.f32 1.0, %v1334_v59 }
 0x2fd   :  { %1335 = vrcp.f32 %v189_v58  ;;  %v201_v9 = vand.u32 2147483648, %v189_v58  ;;  %vm195_vm7 = vweird.f32 %v189_v58  ;;  %v199_v11 = vand.u32 2147483647, %v189_v58 }
 0x2fe   :  { %1337 = vrcp.f32 %v252_v60  ;;  %v264_v20 = vand.u32 2147483648, %v252_v60  ;;  %vm258_vm11 = vweird.f32 %v252_v60  ;;  %v262_v21 = vand.u32 2147483647, %v252_v60 }
 0x2ff   :  { %v202_v15 = vor.u32 1.1754944e-38, %v201_v9  ;;  %vm200_vm9 = vcmp.eq.f32.partialorder %v199_v11, 8.507059e+37 }
 0x300   :  { %v265_v23 = vor.u32 1.1754944e-38, %v264_v20  ;;  %vm263_vm13 = vcmp.eq.f32.partialorder %v262_v21, 8.507059e+37 }
 0x301   :  { %274 = vrot.lane.b32.xlu2 %v1330_v54, %s1449_s16 }
 0x303   :  { %v1336_v61 = vpop.eup %1335 }
 0x304   :  { %v191_v62 = vmul.f32 %v1336_v61, %v189_v58  ;;  %v1338_v0 = vpop.eup %1337  ;;  %vm196_vm6 = vweird.f32 %v1336_v61 }
 0x305   :  { %v254_v4 = vmul.f32 %v1338_v0, %v252_v60  ;;  %vm197_vm8 = vmor %vm195_vm7, %vm196_vm6  ;;  %vm259_vm10 = vweird.f32 %v1338_v0 }
 0x306   :  { %v192_v63 = vsub.f32 1.0, %v191_v62  ;;  %vm260_vm12 = vmor %vm258_vm11, %vm259_vm10 }
 0x307   :  { %v255_v8 = vsub.f32 1.0, %v254_v4 }
 0x308   :  { %v193_v1 = vmul.f32 %v1336_v61, %v192_v63 }
 0x309   :  { %v256_v14 = vmul.f32 %v1338_v0, %v255_v8 }
 0x30a   :  { %v194_v6 = vadd.f32 %v1336_v61, %v193_v1 }
 0x30b   :  { %v257_v19 = vadd.f32 %v1338_v0, %v256_v14 }
 0x30c   :  { %v198_v12 = vsel %vm197_vm8, %v1336_v61, %v194_v6 }
 0x30d   :  { %v203_v17 = vsel %vm200_vm9, %v202_v15, %v198_v12  ;;  %v261_v22 = vsel %vm260_vm12, %v1338_v0, %v257_v19 }
 0x30e   :  { %v266_v24 = vsel %vm263_vm13, %v265_v23, %v261_v22  ;;  %v206_v27 = vmul.f32 0.0, %v203_v17 }
 0x30f   :  { %v272_v31 = vmul.f32 %v270_v30, %v266_v24 }
 0x353   :  { %v209_v16 = vpop.permute.xlu2 %208 }
 0x354   :  { %v211_v18 = vmul.f32 %v209_v16, %v203_v17 }
 0x356   :  { %213 = vrot.lane.b32.xlu0 %v211_v18, %s1450_s3 }
 0x35b   :  { %v275_v25 = vpop.permute.xlu2 %274 }
 0x35c   :  { %v277_v26 = vmul.f32 %v275_v25, %v266_v24 }
 0x35e   :  { %279 = vrot.lane.b32.xlu1 %v277_v26, %s1450_s3 }
 0x36f   :  { %v1712_v57 = vpop.f32.mrf.mxu0 }
 0x3c8   :  { %v214_v28 = vpop.permute.xlu0 %213 }
 0x3c9   :  { %v1677_v29 = vadd.f32 %v214_v28, %v206_v27 }
 0x3cb   :  { %1339 = vtanh.f32 %v1677_v29 }
 0x3d0   :  { %v280_v32 = vpop.permute.xlu1 %279 }
 0x3d1   :  { %v1340_v34 = vpop.eup %1339  ;;  %v1681_v42 = vadd.f32 %v280_v32, %v272_v31 }
 0x3d2   :  { %219 = vrot.lane.b32.xlu2 %v1340_v34, %s1449_s16 }
 0x3d3   :  { %1341 = vtanh.f32 %v1681_v42 }
 0x3d9   :  { %v1342_v43 = vpop.eup %1341 }
 0x3da   :  { %285 = vrot.lane.b32.xlu0 %v1342_v43, %s1449_s16 }
 0x42c   :  { %v220_v45 = vpop.permute.xlu2 %219 }
 0x42d   :  { %v222_v46 = vmul.f32 %v220_v45, %v203_v17 }
 0x42f   :  { %v294_v48 = vrot.slane %v222_v46, 6 }
 0x431   :  { %295 = vrot.lane.b32.xlu2 %v294_v48, %s1449_s16 }
 0x44c   :  { %v286_v49 = vpop.permute.xlu0 %285 }
 0x44d   :  { %v288_v50 = vmul.f32 %v286_v49, %v266_v24  ;;  %v410_v49 = vrot.slane %v1681_v42, 6 }
 0x44f   :  { %v360_v33 = vrot.slane %v288_v50, 2  ;;  %290 = vrot.lane.b32.xlu1 %v288_v50, %s1450_s3 }
 0x451   :  { %361 = vrot.lane.b32.xlu0 %v360_v33, %s1450_s3 }
 0x48b   :  { %v296_v52 = vpop.permute.xlu2 %295 }
 0x4c1   :  { %v291_v53 = vpop.permute.xlu1 %290 }
 0x4c2   :  { %v298_v54 = vsel %vm50_vm0, %v291_v53, %v296_v52 }
 0x4c3   :  { %v300_v55 = vrot.slane %v298_v54, 2  ;;  %v362_v56 = vpop.permute.xlu0 %361 }
 0x4c4   :  { %1285 = vmatmul.msk.f32.vlgmr.msrb.gmra.mxu1 %vm50_vm0, %v362_v56 }
 0x4c5   :  { %1283 = vmatmul.msk.f32.vlgmr.msrb.gmra.mxu0 %vm162_vm5, %v300_v55  ;;  %726 = vmatpush.msrb.mxu1 %v1581_v35 }
 0x4c6   :  { %863 = vmatpush.msrb.mxu0 %v1581_v35 }
 0x4c7   :  { %727 = vmatpush.msrb.mxu1 %v1586_v36 }
 0x4c8   :  { %864 = vmatpush.msrb.mxu0 %v1586_v36 }
 0x4c9   :  { %728 = vmatpush.msrb.mxu1 %v1593_v37 }
 0x4ca   :  { %865 = vmatpush.msrb.mxu0 %v1593_v37 }
 0x4cb   :  { %729 = vmatpush.msrb.mxu1 %v1601_v38 }
 0x4cc   :  { %866 = vmatpush.msrb.mxu0 %v1601_v38 }
 0x4cd   :  { %730 = vmatpush.msrb.mxu1 %v1609_v39 }
 0x4ce   :  { %867 = vmatpush.msrb.mxu0 %v1609_v39 }
 0x4cf   :  { %731 = vmatpush.msrb.mxu1 %v1617_v40 }
 0x4d0   :  { %868 = vmatpush.msrb.mxu0 %v1617_v40 }
 0x4d1   :  { %732 = vmatpush.msrb.mxu1 %v1625_v41 }
 0x4d2   :  { %869 = vmatpush.msrb.mxu0 %v1625_v41 }
 0x4d3   :  { %733 = vmatpush.msrb.mxu1 %v1638_v44 }
 0x4d4   :  { %870 = vmatpush.msrb.mxu0 %v1638_v44 }
 0x541   :  { %v382_v58 = vpop.f32.mrf.mxu1 }
 0x542   :  { %v386_v59 = vrot.slane %v382_v58, 4  ;;  %v320_v60 = vpop.f32.mrf.mxu0 }
 0x543   :  { %v321_v61 = vadd.f32 %v1669_v47, %v320_v60 }
 0x544   :  { %v388_v62 = vadd.f32 %v386_v59, %v1569_v13 }
 0x545   :  { %1343 = vtanh.f32 %v321_v61  ;;  %v1284_v9 = vmul.f32 -1.442695, %v321_v61 }
 0x546   :  { %1345 = vtanh.f32 %v388_v62  ;;  %v1286_v1 = vmul.f32 -1.442695, %v388_v62 }
 0x548   :  { %1347 = vpow2.f32 %v1286_v1 }
 0x54b   :  { %v1344_v63 = vpop.eup %1343 }
 0x54c   :  { %v1346_v0 = vpop.eup %1345  ;;  %345 = vrot.lane.b32.xlu1 %v1344_v63, %s1449_s16 }
 0x54d   :  { %414 = vrot.lane.b32.xlu2 %v1346_v0, %s1449_s16 }
 0x54e   :  { %v1348_v4 = vpop.eup %1347 }
 0x54f   :  { %v392_v6 = vadd.f32 1.0, %v1348_v4 }
 0x551   :  { %1349 = vrcp.f32 %v392_v6  ;;  %v404_v18 = vand.u32 2147483648, %v392_v6  ;;  %vm398_vm15 = vweird.f32 %v392_v6  ;;  %v402_v19 = vand.u32 2147483647, %v392_v6 }
 0x552   :  { %1351 = vpow2.f32 %v1284_v9 }
 0x553   :  { %v405_v21 = vor.u32 1.1754944e-38, %v404_v18  ;;  %vm403_vm2 = vcmp.eq.f32.partialorder %v402_v19, 8.507059e+37 }
 0x557   :  { %v1350_v8 = vpop.eup %1349 }
 0x558   :  { %v394_v11 = vmul.f32 %v1350_v8, %v392_v6  ;;  %v1352_v14 = vpop.eup %1351  ;;  %vm399_vm14 = vweird.f32 %v1350_v8 }
 0x559   :  { %v326_v16 = vadd.f32 1.0, %v1352_v14  ;;  %vm400_vm1 = vmor %vm398_vm15, %vm399_vm14 }
 0x55a   :  { %v395_v12 = vsub.f32 1.0, %v394_v11 }
 0x55b   :  { %1353 = vrcp.f32 %v326_v16  ;;  %v338_v31 = vand.u32 2147483648, %v326_v16  ;;  %vm332_vm4 = vweird.f32 %v326_v16  ;;  %v336_v32 = vand.u32 2147483647, %v326_v16 }
 0x55c   :  { %v396_v15 = vmul.f32 %v1350_v8, %v395_v12 }
 0x55d   :  { %v339_v43 = vor.u32 1.1754944e-38, %v338_v31  ;;  %vm337_vm7 = vcmp.eq.f32.partialorder %v336_v32, 8.507059e+37 }
 0x55e   :  { %v397_v17 = vadd.f32 %v1350_v8, %v396_v15 }
 0x560   :  { %v401_v20 = vsel %vm400_vm1, %v1350_v8, %v397_v17 }
 0x561   :  { %v406_v22 = vsel %vm403_vm2, %v405_v21, %v401_v20  ;;  %v1354_v24 = vpop.eup %1353 }
 0x562   :  { %v328_v26 = vmul.f32 %v1354_v24, %v326_v16  ;;  %vm333_vm3 = vweird.f32 %v1354_v24  ;;  %v412_v50 = vmul.f32 %v410_v49, %v406_v22 }
 0x563   :  { %vm334_vm6 = vmor %vm332_vm4, %vm333_vm3 }
 0x564   :  { %v329_v27 = vsub.f32 1.0, %v328_v26 }
 0x566   :  { %v330_v28 = vmul.f32 %v1354_v24, %v329_v27 }
 0x568   :  { %v331_v30 = vadd.f32 %v1354_v24, %v330_v28 }
 0x56a   :  { %v335_v34 = vsel %vm334_vm6, %v1354_v24, %v331_v30 }
 0x56b   :  { %v340_v46 = vsel %vm337_vm7, %v339_v43, %v335_v34 }
 0x56c   :  { %v343_v53 = vmul.f32 %v340_v46, %v1677_v29 }
 0x5a7   :  { %v415_v23 = vpop.permute.xlu2 %414 }
 0x5a8   :  { %v417_v25 = vmul.f32 %v415_v23, %v406_v22 }
 0x5aa   :  { %419 = vrot.lane.b32.xlu1 %v417_v25, %s1450_s3 }
 0x5be   :  { %v346_v45 = vpop.permute.xlu1 %345 }
 0x5bf   :  { %v348_v48 = vmul.f32 %v346_v45, %v340_v46 }
 0x5c1   :  { %350 = vrot.lane.b32.xlu0 %v348_v48, %s1450_s3 }
 0x61c   :  { %v420_v33 = vpop.permute.xlu1 %419 }
 0x61d   :  { %v1721_v51 = vadd.f32 %v420_v33, %v412_v50 }
 0x61f   :  { %1355 = vtanh.f32 %v1721_v51 }
 0x625   :  { %v1356_v52 = vpop.eup %1355 }
 0x626   :  { %425 = vrot.lane.b32.xlu0 %v1356_v52, %s1449_s16 }
 0x633   :  { %v351_v54 = vpop.permute.xlu0 %350 }
 0x634   :  { %v1726_v55 = vadd.f32 %v351_v54, %v343_v53 }
 0x636   :  { %1357 = vtanh.f32 %v1726_v55 }
 0x63c   :  { %v1358_v56 = vpop.eup %1357 }
 0x63d   :  { %356 = vrot.lane.b32.xlu2 %v1358_v56, %s1449_s16 }
 0x697   :  { %v357_v42 = vpop.permute.xlu2 %356 }
 0x698   :  { %v359_v58 = vmul.f32 %v357_v42, %v340_v46  ;;  %v426_v59 = vpop.permute.xlu0 %425 }
 0x699   :  { %v428_v60 = vmul.f32 %v426_v59, %v406_v22 }
 0x69a   :  { %v434_v61 = vrot.slane %v359_v58, 4  ;;  %v550_v58 = vrot.slane %v1721_v51, 6 }
 0x69b   :  { %v500_v62 = vrot.slane %v428_v60, 4  ;;  %430 = vrot.lane.b32.xlu1 %v428_v60, %s1450_s3 }
 0x69c   :  { %435 = vrot.lane.b32.xlu2 %v434_v61, %s1449_s16 }
 0x69d   :  { %501 = vrot.lane.b32.xlu0 %v500_v62, %s1450_s3 }
 0x6f6   :  { %v436_v29 = vpop.permute.xlu2 %435 }
 0x70d   :  { %v431_v63 = vpop.permute.xlu1 %430 }
 0x70e   :  { %v438_v0 = vsel %vm50_vm0, %v431_v63, %v436_v29 }
 0x70f   :  { %v440_v1 = vrot.slane %v438_v0, 4  ;;  %v502_v4 = vpop.permute.xlu0 %501 }
 0x710   :  { %1289 = vmatmul.msk.f32.vlgmr.msra.gmra.mxu1 %vm50_vm0, %v502_v4 }
 0x711   :  { %1287 = vmatmul.msk.f32.vlgmr.msrb.gmra.mxu3 %vm162_vm5, %v440_v1  ;;  %1069 = vmatpush.msra.mxu1 %v1520_v2 }
 0x712   :  { %1003 = vmatpush.msrb.mxu3 %v1581_v35 }
 0x713   :  { %1070 = vmatpush.msra.mxu1 %v1526_v3 }
 0x714   :  { %1004 = vmatpush.msrb.mxu3 %v1586_v36 }
 0x715   :  { %1071 = vmatpush.msra.mxu1 %v1534_v5 }
 0x716   :  { %1005 = vmatpush.msrb.mxu3 %v1593_v37 }
 0x717   :  { %1072 = vmatpush.msra.mxu1 %v1544_v7 }
 0x718   :  { %1006 = vmatpush.msrb.mxu3 %v1601_v38 }
 0x71a   :  { %1007 = vmatpush.msrb.mxu3 %v1609_v39 }
 0x71c   :  { %1008 = vmatpush.msrb.mxu3 %v1617_v40 }
 0x71e   :  { %1009 = vmatpush.msrb.mxu3 %v1625_v41 }
 0x720   :  { %1010 = vmatpush.msrb.mxu3 %v1638_v44 }
 0x78d   :  { %v522_v2 = vpop.f32.mrf.mxu1 }
 0x78e   :  { %v526_v3 = vrot.slane %v522_v2, 2 }
 0x790   :  { %v528_v6 = vadd.f32 %v526_v3, %v1569_v13 }
 0x792   :  { %1359 = vtanh.f32 %v528_v6  ;;  %v1290_v15 = vmul.f32 -1.442695, %v528_v6 }
 0x794   :  { %v460_v5 = vpop.f32.mrf.mxu3 }
 0x795   :  { %v461_v8 = vadd.f32 %v1669_v47, %v460_v5 }
 0x797   :  { %1361 = vtanh.f32 %v461_v8  ;;  %v1288_v11 = vmul.f32 -1.442695, %v461_v8  ;;  %v1780_v8 = vadd.f32 %v1566_v10, %v1712_v57 }
 0x798   :  { %v1360_v7 = vpop.eup %1359 }
 0x799   :  { %554 = vrot.lane.b32.xlu1 %v1360_v7, %s1449_s16  ;;  %1363 = vpow2.f32 %v1288_v11 }
 0x79d   :  { %v1362_v9 = vpop.eup %1361 }
 0x79e   :  { %485 = vrot.lane.b32.xlu2 %v1362_v9, %s1449_s16 }
 0x79f   :  { %v1364_v12 = vpop.eup %1363 }
 0x7a0   :  { %v466_v14 = vadd.f32 1.0, %v1364_v12 }
 0x7a2   :  { %1365 = vrcp.f32 %v466_v14  ;;  %v478_v22 = vand.u32 2147483648, %v466_v14  ;;  %vm472_vm9 = vweird.f32 %v466_v14  ;;  %v476_v23 = vand.u32 2147483647, %v466_v14 }
 0x7a3   :  { %1367 = vpow2.f32 %v1290_v15 }
 0x7a4   :  { %v479_v26 = vor.u32 1.1754944e-38, %v478_v22  ;;  %vm477_vm11 = vcmp.eq.f32.partialorder %v476_v23, 8.507059e+37 }
 0x7a8   :  { %v1366_v16 = vpop.eup %1365 }
 0x7a9   :  { %v468_v13 = vmul.f32 %v1366_v16, %v466_v14  ;;  %v1368_v17 = vpop.eup %1367  ;;  %vm473_vm8 = vweird.f32 %v1366_v16 }
 0x7aa   :  { %v532_v19 = vadd.f32 1.0, %v1368_v17  ;;  %vm474_vm10 = vmor %vm472_vm9, %vm473_vm8 }
 0x7ab   :  { %v469_v18 = vsub.f32 1.0, %v468_v13 }
 0x7ac   :  { %1369 = vrcp.f32 %v532_v19  ;;  %v544_v45 = vand.u32 2147483648, %v532_v19  ;;  %vm538_vm13 = vweird.f32 %v532_v19  ;;  %v542_v46 = vand.u32 2147483647, %v532_v19 }
 0x7ad   :  { %v470_v20 = vmul.f32 %v1366_v16, %v469_v18 }
 0x7ae   :  { %v545_v49 = vor.u32 1.1754944e-38, %v544_v45  ;;  %vm543_vm15 = vcmp.eq.f32.partialorder %v542_v46, 8.507059e+37 }
 0x7af   :  { %v471_v21 = vadd.f32 %v1366_v16, %v470_v20 }
 0x7b1   :  { %v475_v25 = vsel %vm474_vm10, %v1366_v16, %v471_v21 }
 0x7b2   :  { %v1370_v24 = vpop.eup %1369  ;;  %v480_v28 = vsel %vm477_vm11, %v479_v26, %v475_v25 }
 0x7b3   :  { %v534_v30 = vmul.f32 %v1370_v24, %v532_v19  ;;  %vm539_vm12 = vweird.f32 %v1370_v24  ;;  %v483_v53 = vmul.f32 %v480_v28, %v1726_v55 }
 0x7b4   :  { %vm540_vm14 = vmor %vm538_vm13, %vm539_vm12 }
 0x7b5   :  { %v535_v32 = vsub.f32 1.0, %v534_v30 }
 0x7b7   :  { %v536_v34 = vmul.f32 %v1370_v24, %v535_v32 }
 0x7b9   :  { %v537_v43 = vadd.f32 %v1370_v24, %v536_v34 }
 0x7bb   :  { %v541_v48 = vsel %vm540_vm14, %v1370_v24, %v537_v43 }
 0x7bc   :  { %v546_v33 = vsel %vm543_vm15, %v545_v49, %v541_v48 }
 0x7bd   :  { %v552_v59 = vmul.f32 %v550_v58, %v546_v33 }
 0x7f8   :  { %v486_v27 = vpop.permute.xlu2 %485 }
 0x7f9   :  { %v488_v31 = vmul.f32 %v486_v27, %v480_v28 }
 0x7fb   :  { %490 = vrot.lane.b32.xlu1 %v488_v31, %s1450_s3 }
 0x80b   :  { %v555_v50 = vpop.permute.xlu1 %554 }
 0x80c   :  { %v557_v52 = vmul.f32 %v555_v50, %v546_v33 }
 0x80e   :  { %559 = vrot.lane.b32.xlu0 %v557_v52, %s1450_s3 }
 0x86d   :  { %v491_v54 = vpop.permute.xlu1 %490 }
 0x86e   :  { %v1755_v56 = vadd.f32 %v491_v54, %v483_v53 }
 0x870   :  { %1371 = vtanh.f32 %v1755_v56 }
 0x876   :  { %v1372_v42 = vpop.eup %1371 }
 0x877   :  { %496 = vrot.lane.b32.xlu0 %v1372_v42, %s1449_s16 }
 0x880   :  { %v560_v60 = vpop.permute.xlu0 %559 }
 0x881   :  { %v1760_v61 = vadd.f32 %v560_v60, %v552_v59 }
 0x883   :  { %1373 = vtanh.f32 %v1760_v61  ;;  %v687_v50 = vrot.slane %v1760_v61, 6 }
 0x889   :  { %v1374_v62 = vpop.eup %1373 }
 0x88a   :  { %565 = vrot.lane.b32.xlu2 %v1374_v62, %s1449_s16 }
 0x8e4   :  { %v566_v55 = vpop.permute.xlu2 %565 }
 0x8e5   :  { %v568_v29 = vmul.f32 %v566_v55, %v546_v33 }
 0x8e7   :  { %v640_v63 = vrot.slane %v568_v29, 6  ;;  %570 = vrot.lane.b32.xlu2 %v568_v29, %s1450_s3 }
 0x8e9   :  { %641 = vrot.lane.b32.xlu1 %v640_v63, %s1450_s3  ;;  %v497_v0 = vpop.permute.xlu0 %496 }
 0x8ea   :  { %v499_v1 = vmul.f32 %v497_v0, %v480_v28 }
 0x8ec   :  { %v574_v4 = vrot.slane %v499_v1, 2 }
 0x8ee   :  { %575 = vrot.lane.b32.xlu0 %v574_v4, %s1449_s16 }
 0x941   :  { %v571_v2 = vpop.permute.xlu2 %570 }
 0x95b   :  { %v642_v51 = vpop.permute.xlu1 %641 }
 0x95c   :  { %1293 = vmatmul.msk.f32.vlgmr.msra.gmra.mxu0 %vm50_vm0, %v642_v51 }
 0x960   :  { %v576_v3 = vpop.permute.xlu0 %575 }
 0x961   :  { %v578_v6 = vsel %vm50_vm0, %v571_v2, %v576_v3 }
 0x962   :  { %v580_v5 = vrot.slane %v578_v6, 6 }
 0x964   :  { %1291 = vmatmul.msk.f32.vlgmr.msrb.gmra.mxu2 %vm162_vm5, %v580_v5 }
 0x965   :  { %1143 = vmatpush.msrb.mxu2 %v1581_v35 }
 0x967   :  { %1144 = vmatpush.msrb.mxu2 %v1586_v36 }
 0x969   :  { %1145 = vmatpush.msrb.mxu2 %v1593_v37 }
 0x96b   :  { %1146 = vmatpush.msrb.mxu2 %v1601_v38 }
 0x96d   :  { %1147 = vmatpush.msrb.mxu2 %v1609_v39 }
 0x96f   :  { %1148 = vmatpush.msrb.mxu2 %v1617_v40 }
 0x971   :  { %1149 = vmatpush.msrb.mxu2 %v1625_v41 }
 0x973   :  { %1150 = vmatpush.msrb.mxu2 %v1638_v44 }
 0x9d9   :  { %v662_v7 = vpop.f32.mrf.mxu0 }
 0x9da   :  { %v665_v35 = vadd.f32 %v662_v7, %v1780_v8 }
 0x9dc   :  { %1375 = vtanh.f32 %v665_v35  ;;  %v1294_v44 = vmul.f32 -1.442695, %v665_v35 }
 0x9e2   :  { %v1376_v36 = vpop.eup %1375 }
 0x9e3   :  { %691 = vrot.lane.b32.xlu1 %v1376_v36, %s1449_s16 }
 0x9e7   :  { %v600_v37 = vpop.f32.mrf.mxu2 }
 0x9e8   :  { %v601_v38 = vadd.f32 %v1669_v47, %v600_v37 }
 0x9ea   :  { %1377 = vtanh.f32 %v601_v38  ;;  %v1292_v40 = vmul.f32 -1.442695, %v601_v38 }
 0x9ec   :  { %1379 = vpow2.f32 %v1292_v40 }
 0x9ed   :  { %1381 = vpow2.f32 %v1294_v44 }
 0x9f0   :  { %v1378_v39 = vpop.eup %1377 }
 0x9f1   :  { %625 = vrot.lane.b32.xlu2 %v1378_v39, %s1449_s16 }
 0x9f2   :  { %v1380_v41 = vpop.eup %1379 }
 0x9f3   :  { %v606_v10 = vadd.f32 1.0, %v1380_v41  ;;  %v1382_v57 = vpop.eup %1381 }
 0x9f4   :  { %v669_v11 = vadd.f32 1.0, %v1382_v57 }
 0x9f5   :  { %1383 = vrcp.f32 %v606_v10  ;;  %v618_v18 = vand.u32 2147483648, %v606_v10  ;;  %vm612_vm2 = vweird.f32 %v606_v10  ;;  %v616_v19 = vand.u32 2147483647, %v606_v10 }
 0x9f6   :  { %1385 = vrcp.f32 %v669_v11  ;;  %v681_v28 = vand.u32 2147483648, %v669_v11  ;;  %vm675_vm7 = vweird.f32 %v669_v11  ;;  %v679_v30 = vand.u32 2147483647, %v669_v11 }
 0x9f7   :  { %v619_v22 = vor.u32 1.1754944e-38, %v618_v18  ;;  %vm617_vm4 = vcmp.eq.f32.partialorder %v616_v19, 8.507059e+37 }
 0x9f8   :  { %v682_v32 = vor.u32 1.1754944e-38, %v681_v28  ;;  %vm680_vm9 = vcmp.eq.f32.partialorder %v679_v30, 8.507059e+37 }
 0x9fb   :  { %v1384_v9 = vpop.eup %1383 }
 0x9fc   :  { %v608_v12 = vmul.f32 %v1384_v9, %v606_v10  ;;  %v1386_v15 = vpop.eup %1385  ;;  %vm613_vm1 = vweird.f32 %v1384_v9 }
 0x9fd   :  { %v671_v13 = vmul.f32 %v1386_v15, %v669_v11  ;;  %vm614_vm3 = vmor %vm612_vm2, %vm613_vm1  ;;  %vm676_vm6 = vweird.f32 %v1386_v15 }
 0x9fe   :  { %v609_v14 = vsub.f32 1.0, %v608_v12  ;;  %vm677_vm8 = vmor %vm675_vm7, %vm676_vm6 }
 0x9ff   :  { %v672_v20 = vsub.f32 1.0, %v671_v13 }
 0xa00   :  { %v610_v16 = vmul.f32 %v1384_v9, %v609_v14 }
 0xa01   :  { %v673_v23 = vmul.f32 %v1386_v15, %v672_v20 }
 0xa02   :  { %v611_v17 = vadd.f32 %v1384_v9, %v610_v16 }
 0xa03   :  { %v674_v27 = vadd.f32 %v1386_v15, %v673_v23 }
 0xa04   :  { %v615_v21 = vsel %vm614_vm3, %v1384_v9, %v611_v17 }
 0xa05   :  { %v620_v25 = vsel %vm617_vm4, %v619_v22, %v615_v21  ;;  %v678_v31 = vsel %vm677_vm8, %v1386_v15, %v674_v27 }
 0xa06   :  { %v683_v43 = vsel %vm680_vm9, %v682_v32, %v678_v31  ;;  %v623_v46 = vmul.f32 %v620_v25, %v1755_v56 }
 0xa07   :  { %v689_v52 = vmul.f32 %v687_v50, %v683_v43 }
 0xa4b   :  { %v626_v24 = vpop.permute.xlu2 %625 }
 0xa4c   :  { %v628_v26 = vmul.f32 %v626_v24, %v620_v25 }
 0xa4e   :  { %630 = vrot.lane.b32.xlu1 %v628_v26, %s1450_s3 }
 0xa55   :  { %v692_v34 = vpop.permute.xlu1 %691 }
 0xa56   :  { %v694_v45 = vmul.f32 %v692_v34, %v683_v43 }
 0xa58   :  { %696 = vrot.lane.b32.xlu0 %v694_v45, %s1450_s3 }
 0xac0   :  { %v631_v48 = vpop.permute.xlu1 %630 }
 0xac1   :  { %v1789_v49 = vadd.f32 %v631_v48, %v623_v46 }
 0xac3   :  { %1387 = vtanh.f32 %v1789_v49 }
 0xac9   :  { %v1388_v33 = vpop.eup %1387 }
 0xaca   :  { %636 = vrot.lane.b32.xlu0 %v1388_v33, %s1449_s16  ;;  %v697_v53 = vpop.permute.xlu0 %696 }
 0xacb   :  { %v1794_v54 = vadd.f32 %v697_v53, %v689_v52 }
 0xacd   :  { %1389 = vtanh.f32 %v1794_v54  ;;  %v822_v26 = vrot.slane %v1794_v54, 6 }
 0xad3   :  { %v1390_v42 = vpop.eup %1389 }
 0xad4   :  { %702 = vrot.lane.b32.xlu2 %v1390_v42, %s1449_s16 }
 0xb2e   :  { %v703_v56 = vpop.permute.xlu2 %702 }
 0xb2f   :  { %v705_v58 = vmul.f32 %v703_v56, %v683_v43 }
 0xb31   :  { %707 = vrot.lane.b32.xlu1 %v705_v58, %s1450_s3 }
 0xb3c   :  { %v637_v59 = vpop.permute.xlu0 %636 }
 0xb3d   :  { %v639_v60 = vmul.f32 %v637_v59, %v620_v25 }
 0xb3f   :  { %711 = vrot.lane.b32.xlu2 %v639_v60, %s1449_s16 }
 0xb99   :  { %v712_v61 = vpop.permute.xlu2 %711 }
 0xba3   :  { %v708_v62 = vpop.permute.xlu1 %707 }
 0xba4   :  { %v714_v55 = vsel %vm50_vm0, %v708_v62, %v712_v61  ;;  %1297 = vmatmul.msk.f32.vlgmr.msra.gmra.mxu3 %vm50_vm0, %v708_v62 }
 0xba5   :  { %1295 = vmatmul.msk.f32.vlgmr.msrb.gmra.mxu1 %vm162_vm5, %v714_v55 }
 0xc22   :  { %v735_v29 = vpop.f32.mrf.mxu1 }
 0xc23   :  { %v736_v63 = vadd.f32 %v1669_v47, %v735_v29 }
 0xc25   :  { %1391 = vtanh.f32 %v736_v63  ;;  %v1296_v3 = vmul.f32 -1.442695, %v736_v63 }
 0xc27   :  { %v794_v0 = vpop.f32.mrf.mxu3 }
 0xc28   :  { %v798_v1 = vrot.slane %v794_v0, 6 }
 0xc2a   :  { %v800_v4 = vadd.f32 %v798_v1, %v1780_v8 }
 0xc2b   :  { %v1392_v51 = vpop.eup %1391 }
 0xc2c   :  { %1393 = vtanh.f32 %v800_v4  ;;  %760 = vrot.lane.b32.xlu1 %v1392_v51, %s1449_s16  ;;  %v1298_v6 = vmul.f32 -1.442695, %v800_v4 }
 0xc2d   :  { %1395 = vpow2.f32 %v1296_v3 }
 0xc2e   :  { %1397 = vpow2.f32 %v1298_v6 }
 0xc32   :  { %v1394_v2 = vpop.eup %1393 }
 0xc33   :  { %826 = vrot.lane.b32.xlu0 %v1394_v2, %s1449_s16  ;;  %v1396_v5 = vpop.eup %1395 }
 0xc34   :  { %v741_v7 = vadd.f32 1.0, %v1396_v5  ;;  %v1398_v35 = vpop.eup %1397 }
 0xc35   :  { %v804_v36 = vadd.f32 1.0, %v1398_v35 }
 0xc36   :  { %1399 = vrcp.f32 %v741_v7  ;;  %v753_v9 = vand.u32 2147483648, %v741_v7  ;;  %vm747_vm11 = vweird.f32 %v741_v7  ;;  %v751_v11 = vand.u32 2147483647, %v741_v7 }
 0xc37   :  { %1401 = vrcp.f32 %v804_v36  ;;  %v816_v19 = vand.u32 2147483648, %v804_v36  ;;  %vm810_vm15 = vweird.f32 %v804_v36  ;;  %v814_v20 = vand.u32 2147483647, %v804_v36 }
 0xc38   :  { %v754_v15 = vor.u32 1.1754944e-38, %v753_v9  ;;  %vm752_vm13 = vcmp.eq.f32.partialorder %v751_v11, 8.507059e+37 }
 0xc39   :  { %v817_v22 = vor.u32 1.1754944e-38, %v816_v19  ;;  %vm815_vm2 = vcmp.eq.f32.partialorder %v814_v20, 8.507059e+37 }
 0xc3c   :  { %v1400_v37 = vpop.eup %1399 }
 0xc3d   :  { %v743_v38 = vmul.f32 %v1400_v37, %v741_v7  ;;  %v1402_v39 = vpop.eup %1401  ;;  %vm748_vm10 = vweird.f32 %v1400_v37 }
 0xc3e   :  { %v806_v41 = vmul.f32 %v1402_v39, %v804_v36  ;;  %vm749_vm12 = vmor %vm747_vm11, %vm748_vm10  ;;  %vm811_vm14 = vweird.f32 %v1402_v39 }
 0xc3f   :  { %v744_v40 = vsub.f32 1.0, %v743_v38  ;;  %vm812_vm1 = vmor %vm810_vm15, %vm811_vm14 }
 0xc40   :  { %v807_v10 = vsub.f32 1.0, %v806_v41 }
 0xc41   :  { %v745_v44 = vmul.f32 %v1400_v37, %v744_v40 }
 0xc42   :  { %v808_v12 = vmul.f32 %v1402_v39, %v807_v10 }
 0xc43   :  { %v746_v57 = vadd.f32 %v1400_v37, %v745_v44 }
 0xc44   :  { %v809_v17 = vadd.f32 %v1402_v39, %v808_v12 }
 0xc45   :  { %v750_v14 = vsel %vm749_vm12, %v1400_v37, %v746_v57 }
 0xc46   :  { %v755_v13 = vsel %vm752_vm13, %v754_v15, %v750_v14  ;;  %v813_v21 = vsel %vm812_vm1, %v1402_v39, %v809_v17 }
 0xc47   :  { %v818_v23 = vsel %vm815_vm2, %v817_v22, %v813_v21  ;;  %v758_v32 = vmul.f32 %v755_v13, %v1789_v49 }
 0xc48   :  { %v824_v27 = vmul.f32 %v822_v26, %v818_v23 }
 0xc9e   :  { %v761_v16 = vpop.permute.xlu1 %760 }
 0xc9f   :  { %v763_v18 = vmul.f32 %v761_v16, %v755_v13 }
 0xca1   :  { %765 = vrot.lane.b32.xlu0 %v763_v18, %s1450_s3 }
 0xca5   :  { %v827_v24 = vpop.permute.xlu0 %826 }
 0xca6   :  { %v829_v25 = vmul.f32 %v827_v24, %v818_v23 }
 0xca8   :  { %831 = vrot.lane.b32.xlu2 %v829_v25, %s1450_s3 }
 0xd02   :  { %v832_v28 = vpop.permute.xlu2 %831 }
 0xd03   :  { %v1810_v30 = vadd.f32 %v832_v28, %v824_v27 }
 0xd05   :  { %1403 = vtanh.f32 %v1810_v30  ;;  %v962_v24 = vrot.slane %v1810_v30, 6 }
 0xd0b   :  { %v1404_v31 = vpop.eup %1403 }
 0xd0c   :  { %837 = vrot.lane.b32.xlu1 %v1404_v31, %s1449_s16 }
 0xd13   :  { %v766_v34 = vpop.permute.xlu0 %765 }
 0xd14   :  { %v1815_v43 = vadd.f32 %v766_v34, %v758_v32 }
 0xd16   :  { %1405 = vtanh.f32 %v1815_v43 }
 0xd1c   :  { %v1406_v45 = vpop.eup %1405 }
 0xd1d   :  { %771 = vrot.lane.b32.xlu2 %v1406_v45, %s1449_s16 }
 0xd77   :  { %v772_v46 = vpop.permute.xlu2 %771 }
 0xd78   :  { %v774_v48 = vmul.f32 %v772_v46, %v755_v13 }
 0xd7a   :  { %v846_v50 = vrot.slane %v774_v48, 6 }
 0xd7c   :  { %847 = vrot.lane.b32.xlu2 %v846_v50, %s1449_s16 }
 0xd7e   :  { %v838_v33 = vpop.permute.xlu1 %837 }
 0xd7f   :  { %v840_v52 = vmul.f32 %v838_v33, %v818_v23 }
 0xd81   :  { %v912_v53 = vrot.slane %v840_v52, 2  ;;  %842 = vrot.lane.b32.xlu1 %v840_v52, %s1450_s3 }
 0xd83   :  { %913 = vrot.lane.b32.xlu0 %v912_v53, %s1450_s3 }
 0xdd6   :  { %v848_v49 = vpop.permute.xlu2 %847 }
 0xdf3   :  { %v843_v54 = vpop.permute.xlu1 %842 }
 0xdf4   :  { %v850_v42 = vsel %vm50_vm0, %v843_v54, %v848_v49 }
 0xdf5   :  { %v852_v56 = vrot.slane %v850_v42, 2  ;;  %v914_v58 = vpop.permute.xlu0 %913 }
 0xdf6   :  { %1301 = vmatmul.msk.f32.vlgmr.msra.gmra.mxu2 %vm50_vm0, %v914_v58  ;;  %v1852_v58 = vld [vmem:[%s1915_s5] ss:$0 sm:$0xff] }
 0xdf7   :  { %1299 = vmatmul.msk.f32.vlgmr.msrb.gmra.mxu0 %vm162_vm5, %v852_v56 }
 0xe74   :  { %v872_v59 = vpop.f32.mrf.mxu0 }
 0xe75   :  { %v873_v60 = vadd.f32 %v1669_v47, %v872_v59 }
 0xe77   :  { %1407 = vtanh.f32 %v873_v60  ;;  %v1300_v0 = vmul.f32 -1.442695, %v873_v60 }
 0xe79   :  { %v934_v61 = vpop.f32.mrf.mxu2 }
 0xe7a   :  { %v938_v62 = vrot.slane %v934_v61, 4 }
 0xe7c   :  { %v940_v55 = vadd.f32 %v938_v62, %v1780_v8 }
 0xe7d   :  { %v1408_v29 = vpop.eup %1407 }
 0xe7e   :  { %1409 = vtanh.f32 %v940_v55  ;;  %897 = vrot.lane.b32.xlu0 %v1408_v29, %s1449_s16  ;;  %v1302_v1 = vmul.f32 -1.442695, %v940_v55 }
 0xe7f   :  { %1411 = vpow2.f32 %v1300_v0 }
 0xe80   :  { %1413 = vpow2.f32 %v1302_v1 }
 0xe84   :  { %v1410_v63 = vpop.eup %1409 }
 0xe85   :  { %966 = vrot.lane.b32.xlu1 %v1410_v63, %s1449_s16  ;;  %v1412_v4 = vpop.eup %1411 }
 0xe86   :  { %v878_v51 = vadd.f32 1.0, %v1412_v4  ;;  %v1414_v2 = vpop.eup %1413 }
 0xe87   :  { %v944_v47 = vadd.f32 1.0, %v1414_v2 }
 0xe88   :  { %1415 = vrcp.f32 %v878_v51  ;;  %v890_v39 = vand.u32 2147483648, %v878_v51  ;;  %vm884_vm4 = vweird.f32 %v878_v51  ;;  %v888_v40 = vand.u32 2147483647, %v878_v51 }
 0xe89   :  { %1417 = vrcp.f32 %v944_v47  ;;  %v956_v14 = vand.u32 2147483648, %v944_v47  ;;  %vm950_vm9 = vweird.f32 %v944_v47  ;;  %v954_v15 = vand.u32 2147483647, %v944_v47 }
 0xe8a   :  { %v891_v10 = vor.u32 1.1754944e-38, %v890_v39  ;;  %vm889_vm7 = vcmp.eq.f32.partialorder %v888_v40, 8.507059e+37 }
 0xe8b   :  { %v957_v13 = vor.u32 1.1754944e-38, %v956_v14  ;;  %vm955_vm11 = vcmp.eq.f32.partialorder %v954_v15, 8.507059e+37 }
 0xe8e   :  { %v1416_v3 = vpop.eup %1415 }
 0xe8f   :  { %v880_v6 = vmul.f32 %v1416_v3, %v878_v51  ;;  %v1418_v5 = vpop.eup %1417  ;;  %vm885_vm3 = vweird.f32 %v1416_v3 }
 0xe90   :  { %v946_v35 = vmul.f32 %v1418_v5, %v944_v47  ;;  %vm886_vm6 = vmor %vm884_vm4, %vm885_vm3  ;;  %vm951_vm8 = vweird.f32 %v1418_v5 }
 0xe91   :  { %v881_v7 = vsub.f32 1.0, %v880_v6  ;;  %vm952_vm10 = vmor %vm950_vm9, %vm951_vm8  ;;  %vm1261_vm9 = vcmask 123904  }
 0xe92   :  { %v947_v37 = vsub.f32 1.0, %v946_v35 }
 0xe93   :  { %v882_v36 = vmul.f32 %v1416_v3, %v881_v7 }
 0xe94   :  { %v948_v41 = vmul.f32 %v1418_v5, %v947_v37 }
 0xe95   :  { %v883_v38 = vadd.f32 %v1416_v3, %v882_v36 }
 0xe96   :  { %v949_v11 = vadd.f32 %v1418_v5, %v948_v41 }
 0xe97   :  { %v887_v44 = vsel %vm886_vm6, %v1416_v3, %v883_v38 }
 0xe98   :  { %v892_v57 = vsel %vm889_vm7, %v891_v10, %v887_v44  ;;  %v953_v16 = vsel %vm952_vm10, %v1418_v5, %v949_v11 }
 0xe99   :  { %v958_v18 = vsel %vm955_vm11, %v957_v13, %v953_v16  ;;  %v895_v20 = vmul.f32 %v892_v57, %v1815_v43 }
 0xe9a   :  { %v964_v25 = vmul.f32 %v962_v24, %v958_v18 }
 0xef0   :  { %v898_v9 = vpop.permute.xlu0 %897 }
 0xef1   :  { %v900_v12 = vmul.f32 %v898_v9, %v892_v57 }
 0xef3   :  { %902 = vrot.lane.b32.xlu2 %v900_v12, %s1450_s3 }
 0xef7   :  { %v967_v17 = vpop.permute.xlu1 %966 }
 0xef8   :  { %v969_v19 = vmul.f32 %v967_v17, %v958_v18 }
 0xefa   :  { %971 = vrot.lane.b32.xlu0 %v969_v19, %s1450_s3 }
 0xf4d   :  { %v903_v21 = vpop.permute.xlu2 %902 }
 0xf4e   :  { %v1832_v22 = vadd.f32 %v903_v21, %v895_v20 }
 0xf50   :  { %1419 = vtanh.f32 %v1832_v22 }
 0xf56   :  { %v1420_v23 = vpop.eup %1419 }
 0xf57   :  { %908 = vrot.lane.b32.xlu1 %v1420_v23, %s1449_s16 }
 0xf6c   :  { %v972_v26 = vpop.permute.xlu0 %971 }
 0xf6d   :  { %v1837_v27 = vadd.f32 %v972_v26, %v964_v25 }
 0xf6f   :  { %1421 = vtanh.f32 %v1837_v27  ;;  %v1102_v15 = vrot.slane %v1837_v27, 6 }
 0xf75   :  { %v1422_v28 = vpop.eup %1421 }
 0xf76   :  { %977 = vrot.lane.b32.xlu2 %v1422_v28, %s1449_s16 }
 0xfc9   :  { %v909_v31 = vpop.permute.xlu1 %908 }
 0xfca   :  { %v911_v32 = vmul.f32 %v909_v31, %v892_v57 }
 0xfcc   :  { %v986_v34 = vrot.slane %v911_v32, 4 }
 0xfce   :  { %987 = vrot.lane.b32.xlu1 %v986_v34, %s1449_s16 }
 0xfd0   :  { %v978_v43 = vpop.permute.xlu2 %977 }
 0xfd1   :  { %v980_v45 = vmul.f32 %v978_v43, %v958_v18 }
 0xfd3   :  { %v1052_v46 = vrot.slane %v980_v45, 4  ;;  %982 = vrot.lane.b32.xlu0 %v980_v45, %s1450_s3 }
 0xfd5   :  { %1053 = vrot.lane.b32.xlu2 %v1052_v46, %s1450_s3 }
0x102f   :  { %v1054_v30 = vpop.permute.xlu2 %1053 }
0x1030   :  { %1305 = vmatmul.msk.f32.vlgmr.msra.gmra.mxu1 %vm50_vm0, %v1054_v30 }
0x1040   :  { %v988_v48 = vpop.permute.xlu1 %987 }
0x1045   :  { %v983_v50 = vpop.permute.xlu0 %982 }
0x1046   :  { %v990_v33 = vsel %vm50_vm0, %v983_v50, %v988_v48 }
0x1047   :  { %v992_v52 = vrot.slane %v990_v33, 4 }
0x1049   :  { %1303 = vmatmul.msk.f32.vlgmr.msrb.gmra.mxu3 %vm162_vm5, %v992_v52 }
0x10ad   :  { %v1074_v53 = vpop.f32.mrf.mxu1 }
0x10ae   :  { %v1078_v49 = vrot.slane %v1074_v53, 2 }
0x10b0   :  { %v1080_v54 = vadd.f32 %v1078_v49, %v1780_v8 }
0x10b2   :  { %1423 = vtanh.f32 %v1080_v54  ;;  %v1306_v61 = vmul.f32 -1.442695, %v1080_v54 }
0x10b8   :  { %v1424_v42 = vpop.eup %1423 }
0x10b9   :  { %1106 = vrot.lane.b32.xlu1 %v1424_v42, %s1449_s16 }
0x10cc   :  { %v1012_v56 = vpop.f32.mrf.mxu3 }
0x10cd   :  { %v1013_v59 = vadd.f32 %v1852_v58, %v1012_v56 }
0x10cf   :  { %1425 = vtanh.f32 %v1013_v59  ;;  %v1304_v63 = vmul.f32 -1.442695, %v1013_v59 }
0x10d0   :  { %1427 = vpow2.f32 %v1306_v61 }
0x10d5   :  { %v1426_v60 = vpop.eup %1425 }
0x10d6   :  { %1037 = vrot.lane.b32.xlu0 %v1426_v60, %s1449_s16  ;;  %v1428_v62 = vpop.eup %1427 }
0x10d7   :  { %v1084_v8 = vadd.f32 1.0, %v1428_v62 }
0x10d9   :  { %1429 = vrcp.f32 %v1084_v8  ;;  %v1096_v2 = vand.u32 2147483648, %v1084_v8  ;;  %vm1090_vm13 = vweird.f32 %v1084_v8  ;;  %v1094_v47 = vand.u32 2147483647, %v1084_v8 }
0x10da   :  { %1431 = vpow2.f32 %v1304_v63  ;;  %v1193_v63 = vld [vmem:[%s1916_s6 + $0x8] sm:$0xff] }
0x10db   :  { %v1097_v5 = vor.u32 1.1754944e-38, %v1096_v2  ;;  %vm1095_vm15 = vcmp.eq.f32.partialorder %v1094_v47, 8.507059e+37 }
0x10df   :  { %v1430_v55 = vpop.eup %1429 }
0x10e0   :  { %v1086_v29 = vmul.f32 %v1430_v55, %v1084_v8  ;;  %vm1091_vm12 = vweird.f32 %v1430_v55  ;;  %v1432_v51 = vpop.eup %1431 }
0x10e1   :  { %vm1092_vm14 = vmor %vm1090_vm13, %vm1091_vm12  ;;  %v1018_v3 = vadd.f32 1.0, %v1432_v51 }
0x10e2   :  { %v1087_v0 = vsub.f32 1.0, %v1086_v29  ;;  %v1194_v29 = vld [vmem:[%s1916_s6 + $0x10] sm:$0xff] }
0x10e3   :  { %1433 = vrcp.f32 %v1018_v3  ;;  %v1030_v44 = vand.u32 2147483648, %v1018_v3  ;;  %vm1024_vm2 = vweird.f32 %v1018_v3  ;;  %v1028_v10 = vand.u32 2147483647, %v1018_v3 }
0x10e4   :  { %v1088_v1 = vmul.f32 %v1430_v55, %v1087_v0  ;;  %v1192_v0 = vld [vmem:[%s1916_s6] sm:$0xff] }
0x10e5   :  { %v1031_v9 = vor.u32 1.1754944e-38, %v1030_v44  ;;  %vm1029_vm4 = vcmp.eq.f32.partialorder %v1028_v10, 8.507059e+37 }
0x10e6   :  { %v1089_v4 = vadd.f32 %v1430_v55, %v1088_v1 }
0x10e8   :  { %v1093_v6 = vsel %vm1092_vm14, %v1430_v55, %v1089_v4  ;;  %v1195_v55 = vld [vmem:[%s1916_s6 + $0x18] sm:$0xff] }
0x10e9   :  { %v1098_v35 = vsel %vm1095_vm15, %v1097_v5, %v1093_v6  ;;  %v1434_v37 = vpop.eup %1433  ;;  %1242 = vmatpush.msrb.mxu1 %v1195_v55  ;;  %v1198_v6 = vld [vmem:[%s1918_s7 + $0x10] sm:$0xff]  ;;  %v1197_v5 = vld [vmem:[%s1918_s7 + $0x8] sm:$0xff] }
0x10ea   :  { %v1020_v38 = vmul.f32 %v1434_v37, %v1018_v3  ;;  %vm1025_vm1 = vweird.f32 %v1434_v37  ;;  %v1104_v16 = vmul.f32 %v1102_v15, %v1098_v35  ;;  %v1199_v3 = vld [vmem:[%s1918_s7 + $0x18] sm:$0xff] }
0x10eb   :  { %vm1026_vm3 = vmor %vm1024_vm2, %vm1025_vm1  ;;  %1243 = vmatpush.msrb.mxu1 %v1194_v29  ;;  %1217 = vmatpush.msra.mxu0 %v1199_v3 }
0x10ec   :  { %v1021_v39 = vsub.f32 1.0, %v1020_v38  ;;  %v16_v38 = vstv %s1920_s10 }
0x10ed   :  { %1244 = vmatpush.msrb.mxu1 %v1193_v63  ;;  %1218 = vmatpush.msra.mxu0 %v1198_v6  ;;  %17 = vst [vmem:[#allocation2] sm:$0x1] %v16_v38 }
0x10ee   :  { %v1022_v40 = vmul.f32 %v1434_v37, %v1021_v39  ;;  %v1316_v39 = vld [vmem:[%s1917_s8] ss:$0 sm:$0xff] }
0x10ef   :  { %1245 = vmatpush.msrb.mxu1 %v1192_v0  ;;  %1219 = vmatpush.msra.mxu0 %v1197_v5 }
0x10f0   :  { %v1023_v41 = vadd.f32 %v1434_v37, %v1022_v40 }
0x10f2   :  { %v1027_v57 = vsel %vm1026_vm3, %v1434_v37, %v1023_v41 }
0x10f3   :  { %v1032_v12 = vsel %vm1029_vm4, %v1031_v9, %v1027_v57  ;;  %v1317_v57 = vld [vmem:[%s1919_s9] ss:$0 sm:$0xff] }
0x10f4   :  { %v1035_v18 = vmul.f32 %v1032_v12, %v1832_v22 }
0x112b   :  { %v1107_v7 = vpop.permute.xlu1 %1106 }
0x112c   :  { %v1109_v36 = vmul.f32 %v1107_v7, %v1098_v35  ;;  %v1196_v7 = vld [vmem:[%s1918_s7] sm:$0xff] }
0x112d   :  { %1220 = vmatpush.msra.mxu0 %v1196_v7 }
0x112e   :  { %1111 = vrot.lane.b32.xlu0 %v1109_v36, %s1450_s3 }
0x1148   :  { %v1038_v11 = vpop.permute.xlu0 %1037 }
0x1149   :  { %v1040_v14 = vmul.f32 %v1038_v11, %v1032_v12 }
0x114b   :  { %1042 = vrot.lane.b32.xlu2 %v1040_v14, %s1450_s3  ;;  %v1318_v14 = vld [vmem:[#allocation2] ss:$0 sm:$0xff] }
0x11a0   :  { %v1112_v13 = vpop.permute.xlu0 %1111 }
0x11a1   :  { %v1114_v17 = vadd.f32 %v1112_v13, %v1104_v16 }
0x11a3   :  { %1435 = vtanh.f32 %v1114_v17 }
0x11a5   :  { %v1043_v19 = vpop.permute.xlu2 %1042 }
0x11a6   :  { %v1045_v20 = vadd.f32 %v1043_v19, %v1035_v18 }
0x11a8   :  { %1437 = vtanh.f32 %v1045_v20 }
0x11a9   :  { %v1436_v21 = vpop.eup %1435 }
0x11aa   :  { %1117 = vrot.lane.b32.xlu2 %v1436_v21, %s1449_s16 }
0x11ae   :  { %v1438_v23 = vpop.eup %1437 }
0x11af   :  { %1048 = vrot.lane.b32.xlu1 %v1438_v23, %s1449_s16 }
0x1204   :  { %v1118_v24 = vpop.permute.xlu2 %1117 }
0x1205   :  { %v1120_v25 = vmul.f32 %v1118_v24, %v1098_v35 }
0x1207   :  { %1122 = vrot.lane.b32.xlu0 %v1120_v25, %s1450_s3  ;;  %v1225_v8 = vrot.slane %v1120_v25, 6 }
0x1221   :  { %v1049_v26 = vpop.permute.xlu1 %1048 }
0x1222   :  { %v1051_v27 = vmul.f32 %v1049_v26, %v1032_v12 }
0x1224   :  { %v1126_v28 = vrot.slane %v1051_v27, 2 }
0x1226   :  { %1127 = vrot.lane.b32.xlu1 %v1126_v28, %s1449_s16 }
0x1279   :  { %v1123_v31 = vpop.permute.xlu0 %1122 }
0x1298   :  { %v1128_v22 = vpop.permute.xlu1 %1127 }
0x1299   :  { %v1130_v32 = vsel %vm50_vm0, %v1123_v31, %v1128_v22 }
0x129a   :  { %v1132_v34 = vrot.slane %v1130_v32, 6 }
0x129c   :  { %1307 = vmatmul.msk.f32.vlgmr.msrb.gmra.mxu2 %vm162_vm5, %v1132_v34 }
0x131f   :  { %v1152_v43 = vpop.f32.mrf.mxu2 }
0x1320   :  { %v1153_v45 = vadd.f32 %v1852_v58, %v1152_v43 }
0x1322   :  { %1439 = vtanh.f32 %v1153_v45  ;;  %v1308_v30 = vmul.f32 -1.442695, %v1153_v45 }
0x1324   :  { %1441 = vpow2.f32 %v1308_v30 }
0x1328   :  { %v1440_v46 = vpop.eup %1439 }
0x1329   :  { %1177 = vrot.lane.b32.xlu2 %v1440_v46, %s1449_s16 }
0x132a   :  { %v1442_v48 = vpop.eup %1441 }
0x132b   :  { %v1158_v50 = vadd.f32 1.0, %v1442_v48 }
0x132d   :  { %1443 = vrcp.f32 %v1158_v50  ;;  %v1170_v42 = vand.u32 2147483648, %v1158_v50  ;;  %vm1164_vm5 = vweird.f32 %v1158_v50  ;;  %v1168_v56 = vand.u32 2147483647, %v1158_v50 }
0x132f   :  { %v1171_v59 = vor.u32 1.1754944e-38, %v1170_v42  ;;  %vm1169_vm8 = vcmp.eq.f32.partialorder %v1168_v56, 8.507059e+37 }
0x1333   :  { %v1444_v33 = vpop.eup %1443 }
0x1334   :  { %v1160_v52 = vmul.f32 %v1444_v33, %v1158_v50  ;;  %vm1165_vm6 = vweird.f32 %v1444_v33 }
0x1335   :  { %vm1166_vm7 = vmor %vm1164_vm5, %vm1165_vm6 }
0x1336   :  { %v1161_v53 = vsub.f32 1.0, %v1160_v52 }
0x1338   :  { %v1162_v49 = vmul.f32 %v1444_v33, %v1161_v53 }
0x133a   :  { %v1163_v54 = vadd.f32 %v1444_v33, %v1162_v49 }
0x133c   :  { %v1167_v58 = vsel %vm1166_vm7, %v1444_v33, %v1163_v54 }
0x133d   :  { %v1172_v61 = vsel %vm1169_vm8, %v1171_v59, %v1167_v58 }
0x133e   :  { %v1175_v1 = vmul.f32 %v1172_v61, %v1045_v20 }
0x1383   :  { %v1178_v60 = vpop.permute.xlu2 %1177 }
0x1384   :  { %v1180_v62 = vmul.f32 %v1178_v60, %v1172_v61 }
0x1386   :  { %1182 = vrot.lane.b32.xlu0 %v1180_v62, %s1450_s3 }
0x138e   :  { %1226 = vrot.lane.b32.xlu0 %v1225_v8, %s1450_s3 }
0x13f8   :  { %v1183_v4 = vpop.permute.xlu0 %1182 }
0x13f9   :  { %v1185_v51 = vadd.f32 %v1183_v4, %v1175_v1 }
0x13fb   :  { %1445 = vtanh.f32 %v1185_v51 }
0x1400   :  { %v1227_v2 = vpop.permute.xlu0 %1226 }
0x1401   :  { %v1446_v47 = vpop.eup %1445  ;;  %1310 = vmatmul.msk.f32.vlgmr.msrb.gmra.mxu1 %vm50_vm0, %v1227_v2 }
0x1402   :  { %1188 = vrot.lane.b32.xlu1 %v1446_v47, %s1449_s16 }
0x1474   :  { %v1189_v35 = vpop.permute.xlu1 %1188 }
0x1475   :  { %v1191_v36 = vmul.f32 %v1189_v35, %v1172_v61 }
0x1477   :  { %1201 = vrot.lane.b32.xlu2 %v1191_v36, %s1450_s3 }
0x147e   :  { %v1247_v40 = vpop.f32.mrf.mxu1 }
0x14d1   :  { %v1202_v37 = vpop.permute.xlu2 %1201 }
0x14d2   :  { %1309 = vmatmul.msk.f32.vlgmr.msra.gmra.mxu0 %vm50_vm0, %v1202_v37  ;;  %vm1270_vm0 = vcmask 1024  }
0x154f   :  { %v1222_v41 = vpop.f32.mrf.mxu0 }
0x1550   :  { %v1248_v44 = vadd.f32 %v1247_v40, %v1222_v41 }
0x1552   :  { %v1254_v10 = vadd.f32 %v1316_v39, %v1248_v44 }
0x1554   :  { %v1255_v9 = vmax.f32 %v1254_v10, 0.0 }
0x1556   :  { %v1260_v11 = vmul.f32 %v1317_v57, %v1255_v9 }
0x1558   :  { %v1262_v12 = vsel %vm1261_vm9, %v1260_v11, 0.0 }
0x1559   :  { %1263 = vadd.xlane.f32.xlu1 %v1262_v12 }
0x15cc   :  { %v1264_v15 = vpop.xlane.xlu1 %1263 }
0x15cd   :  { %v1269_v16 = vadd.f32 %v1318_v14, %v1264_v15 }
0x15cf   :  { %1271 = vst.msk [vmem:[%s1921_s11] sm:$0x3] %vm1270_vm0, %v1269_v16 }

</bundles_post_ra>
